<compile_context>
chip_gen: v5e
topology: v5e:2x2
jax: 0.10.0
libtpu: 0.0.40
codegen_flags: <defaults>
</compile_context>

<pallas_src>
import functools

import jax
import jax.numpy as jnp
from jax import lax
from jax.experimental import pallas as pl
from jax.experimental.pallas import tpu as pltpu

NEG_BIG = 1e30


def _round_up(x, k):
    return ((x + k - 1) // k) * k


def _vmem_ceiling_bytes():
    """~3/4 of the chip's VMEM; conservative 64 MiB fallback (v7x per-TC)."""
    cap = None
    try:
        info = pltpu.get_tpu_info()
        for name in ("vmem_capacity_bytes", "vmem_bytes", "vmem_size_bytes"):
            val = getattr(info, name, None)
            if val:
                cap = int(val)
                break
    except Exception:
        cap = None
    if not cap:
        cap = 64 * 1024 * 1024
    return (3 * cap) // 4


def _step_vmem_bytes(bb, n, m, d):
    """Per-grid-step VMEM: double-buffered I/O blocks + live f32 intermediates."""
    in_bytes = bb * ((n + m) * d * 2 + (n + m) * 4)        # bf16 C,Q + f32 masks
    out_bytes = bb * 2 * n * d * 4                         # f32 A, B blocks
    inter = bb * ((6 * n * m + m * d + 2 * n * d) * 4      # cross/crossT/softmax temps, Mq, A/B
                  + m * d * 2)                             # Qx (bf16)
    return 2 * (in_bytes + out_bytes) + inter


def cqa_kernel(c_ref, q_ref, cadd_ref, qadd_ref, w_ref, a_ref, bout_ref, *,
               dot_dtype):
    Cb = c_ref[...]                        # (bb, n, d) bf16
    Qb = q_ref[...]                        # (bb, m, d) bf16
    w_q = w_ref[0:1, :]                    # (1, d) f32 -> multiplies Q
    w_c = w_ref[1:2, :]                    # (1, d) f32 -> multiplies C
    w_x = w_ref[2:3, :]                    # (1, d) f32 -> multiplies C*Q product

    # Fold w_x into the small (m, d) operand; f32 multiply, bf16 MXU operand.
    Qx = (Qb * w_x).astype(dot_dtype)      # (bb, m, d)

    def bdot_t(x, y):                      # einsum('bik,bjk->bij'), f32 accumulation
        return lax.dot_general(x, y, (((2,), (2,)), ((0,), (0,))),
                               preferred_element_type=jnp.float32)

    def bmm(x, y):                         # einsum('bik,bkj->bij'), f32 accumulation
        return lax.dot_general(x, y, (((2,), (1,)), ((0,), (0,))),
                               preferred_element_type=jnp.float32)

    # Similarity cross term in both layouts via two bf16 MXU matmuls; the
    # (m, n) layout replaces an f32 XLU transpose of the (n, m) tile.
    cross = bdot_t(Cb, Qx)                 # (bb, n, m) f32
    crossT = bdot_t(Qx, Cb)                # (bb, m, n) f32

    # Row terms: bf16 * f32 promotes to f32 on the VPU before the lane reduce.
    c_row = jnp.sum(Cb * w_c, axis=-1)[:, None, :]   # (bb, 1, n)
    q_row = jnp.sum(Qb * w_q, axis=-1)[:, None, :]   # (bb, 1, m)

    # bias + NEG_BIG*(mask - 1) arrive pre-folded -> one broadcast add / softmax.
    qadd = q_row + qadd_ref[...]           # (bb, 1, m)
    cadd = c_row + cadd_ref[...]           # (bb, 1, n)

    # ---- S_: softmax over the query axis (torch dim=2) ----------------------
    # <w_c, C> is constant along the query axis and cancels, so it is omitted.
    Sq = cross + qadd
    Eq = jnp.exp(Sq - jnp.max(Sq, axis=-1, keepdims=True))
    S_ = Eq * pl.reciprocal(jnp.sum(Eq, axis=-1, keepdims=True), approx=True)

    # ---- S__^T: context-axis softmax (torch dim=1), directly in (m, n) ------
    # layout -- exactly the operand the reassociated B-path needs.
    # <w_q, Q> is constant along the context axis and cancels.
    Sc = crossT + cadd
    Ec = jnp.exp(Sc - jnp.max(Sc, axis=-1, keepdims=True))
    S__T = Ec * pl.reciprocal(jnp.sum(Ec, axis=-1, keepdims=True), approx=True)

    # ---- outputs: bf16 MXU operands, f32 accumulation ------------------------
    Sd = S_.astype(dot_dtype)
    A = bmm(Sd, Qb)                                  # (bb, n, d)
    Mq = bmm(S__T.astype(dot_dtype), Cb)             # (bb, m, d)
    Bm = bmm(Sd, Mq.astype(dot_dtype))               # (bb, n, d) = S_ @ (S__^T @ C)

    a_ref[...] = A.astype(a_ref.dtype)
    bout_ref[...] = Bm.astype(bout_ref.dtype)


def context_query_attention(C, Q, c_mask, q_mask, w_full, bias, *,
                            block_b=None, dot_dtype=jnp.bfloat16):
    """C: (B, d, n), Q: (B, d, m), c_mask: (B, n), q_mask: (B, m),
    w_full: (3*d,) (= W0.weight[0]), bias: scalar (= W0.bias[0]).
    Returns (A, B), each (B, n, d) float32, matching the PyTorch module."""
    Bsz, d, n = C.shape
    m = Q.shape[2]

    # Lane/MXU-friendly padded extents: d (output lane dim) and m (softmax lane
    # dim / output-matmul contraction dim) to 128, n to 16 (bf16 sublane pack).
    d_p = _round_up(d, 128)
    m_p = _round_up(m, 128)
    n_p = _round_up(n, 16)

    # One fused XLA pass per input: channels-last transpose + zero-pad + bf16.
    Ct = jnp.pad(jnp.transpose(C, (0, 2, 1)).astype(dot_dtype),
                 ((0, 0), (0, n_p - n), (0, d_p - d)))          # (B, n_p, d_p)
    Qt = jnp.pad(jnp.transpose(Q, (0, 2, 1)).astype(dot_dtype),
                 ((0, 0), (0, m_p - m), (0, d_p - d)))          # (B, m_p, d_p)

    # Additive masks with bias pre-folded; padded positions get -1e30.
    bias_f = jnp.asarray(bias, jnp.float32)
    cm_p = jnp.pad(c_mask.astype(jnp.float32), ((0, 0), (0, n_p - n)))
    qm_p = jnp.pad(q_mask.astype(jnp.float32), ((0, 0), (0, m_p - m)))
    cadd = (NEG_BIG * (cm_p - 1.0) + bias_f).reshape(Bsz, 1, n_p)
    qadd = (NEG_BIG * (qm_p - 1.0) + bias_f).reshape(Bsz, 1, m_p)

    w = jnp.asarray(w_full, jnp.float32)
    Wk = jnp.pad(jnp.stack([w[:d], w[d:2 * d], w[2 * d:]], axis=0),
                 ((0, 0), (0, d_p - d)))                        # (3, d_p)

    vmem_ceiling = _vmem_ceiling_bytes()
    if block_b is None:
        cands = [bb for bb in range(1, min(Bsz, 16) + 1) if Bsz % bb == 0]
        fits = [bb for bb in cands
                if _step_vmem_bytes(bb, n_p, m_p, d_p) <= vmem_ceiling] or [1]
        # Keep >= 2 grid steps when possible so both v7x TensorCores get work.
        pref = [bb for bb in fits if Bsz // bb >= 2] or fits
        block_b = max(pref)
    assert Bsz % block_b == 0, "block_b must divide the batch size"

    step_bytes = _step_vmem_bytes(block_b, n_p, m_p, d_p)
    vmem_limit = int(min(vmem_ceiling, max(2 * step_bytes, 32 * 1024 * 1024)))

    grid_spec = pltpu.PrefetchScalarGridSpec(
        num_scalar_prefetch=0,
        grid=(Bsz // block_b,),
        in_specs=[
            pl.BlockSpec((block_b, n_p, d_p), lambda b: (b, 0, 0)),   # C (bf16)
            pl.BlockSpec((block_b, m_p, d_p), lambda b: (b, 0, 0)),   # Q (bf16)
            pl.BlockSpec((block_b, 1, n_p), lambda b: (b, 0, 0)),     # cadd
            pl.BlockSpec((block_b, 1, m_p), lambda b: (b, 0, 0)),     # qadd
            pl.BlockSpec((3, d_p), lambda b: (0, 0)),                 # W rows
        ],
        out_specs=[
            pl.BlockSpec((block_b, n_p, d_p), lambda b: (b, 0, 0)),   # A
            pl.BlockSpec((block_b, n_p, d_p), lambda b: (b, 0, 0)),   # B
        ],
    )

    # Advisory cost hint for XLA scheduling around the custom call.
    macs = 5 * Bsz * n_p * m_p * d_p          # cross, crossT, A, Mq, Bm
    cost = pl.CostEstimate(
        flops=2 * macs + 10 * Bsz * n_p * m_p,
        transcendentals=2 * Bsz * n_p * m_p,
        bytes_accessed=(Bsz * (n_p + m_p) * d_p * 2      # bf16 C, Q in
                        + Bsz * (n_p + m_p) * 4          # additive masks
                        + 2 * Bsz * n_p * d_p * 4        # f32 A, B out
                        + 3 * d_p * 4),                  # W rows
    )

    kernel = functools.partial(cqa_kernel, dot_dtype=dot_dtype)
    A_p, B_p = pl.pallas_call(
        kernel,
        out_shape=(
            jax.ShapeDtypeStruct((Bsz, n_p, d_p), jnp.float32),
            jax.ShapeDtypeStruct((Bsz, n_p, d_p), jnp.float32),
        ),
        grid_spec=grid_spec,
        compiler_params=pltpu.CompilerParams(
            dimension_semantics=("parallel",),
            vmem_limit_bytes=vmem_limit,
        ),
        cost_estimate=cost,
    )(Ct, Qt, cadd, qadd, Wk)

    # Strip the padding back to the module's (B, n, d) outputs.
    return A_p[:, :n, :d], B_p[:, :n, :d]


def reference(C, Q, c_mask, q_mask, w_full, bias):
    """Plain-JAX replica of the PyTorch forward (eval mode), pure f32."""
    Ct = jnp.transpose(C, (0, 2, 1)).astype(jnp.float32)   # (B, n, d)
    Qt = jnp.transpose(Q, (0, 2, 1)).astype(jnp.float32)   # (B, m, d)
    d = Ct.shape[-1]
    w1, w2, w3 = w_full[:d], w_full[d:2 * d], w_full[2 * d:]
    S = (jnp.einsum('bmd,d->bm', Qt, w1)[:, None, :]
         + jnp.einsum('bnd,d->bn', Ct, w2)[:, :, None]
         + jnp.einsum('bnd,bmd->bnm', Ct * w3, Qt)
         + bias)                                           # (B, n, m)
    S_ = jax.nn.softmax(S - NEG_BIG * (1.0 - q_mask[:, None, :]), axis=2)
    S__ = jax.nn.softmax(S - NEG_BIG * (1.0 - c_mask[:, :, None]), axis=1)
    A = jnp.einsum('bnm,bmd->bnd', S_, Qt)
    Bm = jnp.einsum('bnk,bkd->bnd', jnp.einsum('bnm,bkm->bnk', S_, S__), Ct)
    return A, Bm


if __name__ == "__main__":
    key = jax.random.PRNGKey(0)
    k_c, k_q, k_w, k_b = jax.random.split(key, 4)

    batch, hidden, n, m = 2, 32, 16, 8   # small hidden_size for a quick run

    C = jax.random.normal(k_c, (batch, hidden, n), dtype=jnp.float32)   # (B, d, n)
    Q = jax.random.normal(k_q, (batch, hidden, m), dtype=jnp.float32)   # (B, d, m)

    # masks: 1.0 for valid positions, 0.0 for padding
    c_mask = (jnp.arange(n)[None, :] < jnp.array([[n], [n - 4]])).astype(jnp.float32)
    q_mask = (jnp.arange(m)[None, :] < jnp.array([[m], [m - 3]])).astype(jnp.float32)

    # W0 = nn.Linear(3*d, 1): weight (1, 3d) xavier_normal, bias (1,)
    fan_in, fan_out = 3 * hidden, 1
    xavier_std = (2.0 / (fan_in + fan_out)) ** 0.5
    w_full = xavier_std * jax.random.normal(k_w, (3 * hidden,), dtype=jnp.float32)
    bound = 1.0 / (fan_in ** 0.5)
    bias = jax.random.uniform(k_b, (), minval=-bound, maxval=bound, dtype=jnp.float32)

    A, B = context_query_attention(C, Q, c_mask, q_mask, w_full, bias)
    jax.block_until_ready((A, B))

    A_ref, B_ref = reference(C, Q, c_mask, q_mask, w_full, bias)
    assert A.shape == (batch, n, hidden) and B.shape == (batch, n, hidden)
    # Tolerance sized for bf16 HBM inputs + bf16 MXU operands (f32 accumulation)
    # + approximate EUP reciprocal, compared against a pure-f32 reference.
    assert jnp.allclose(A, A_ref, atol=5e-2, rtol=5e-2), "A mismatch"
    assert jnp.allclose(B, B_ref, atol=5e-2, rtol=5e-2), "B mismatch"

    print("KERNEL_OK")
</pallas_src>

<mosaic_0001>
module attributes {stable_mosaic.version = 11 : i64} {
  func.func @cqa_kernel(%arg0: i32, %arg1: memref<1x16x128xbf16, #tpu.memory_space<vmem>>, %arg2: memref<1x128x128xbf16, #tpu.memory_space<vmem>>, %arg3: memref<1x1x16xf32, #tpu.memory_space<vmem>>, %arg4: memref<1x1x128xf32, #tpu.memory_space<vmem>>, %arg5: memref<3x128xf32, #tpu.memory_space<vmem>>, %arg6: memref<1x16x128xf32, #tpu.memory_space<vmem>>, %arg7: memref<1x16x128xf32, #tpu.memory_space<vmem>>) attributes {dimension_semantics = [#tpu.dimension_semantics<parallel>], iteration_bounds = array<i64: 2>, scalar_prefetch = 0 : i64, scratch_operands = 0 : i64, tpu.core_type = #tpu.core_type<tc>, window_params = [{transform_indices = @transform_0, window_bounds = array<i64: 1, 16, 128>}, {transform_indices = @transform_1, window_bounds = array<i64: 1, 128, 128>}, {transform_indices = @transform_2, window_bounds = array<i64: 1, 1, 16>}, {transform_indices = @transform_3, window_bounds = array<i64: 1, 1, 128>}, {pipeline_mode = #tpu.pipeline_mode<synchronous>, transform_indices = @transform_4, window_bounds = array<i64: 3, 128>}, {transform_indices = @transform_5, window_bounds = array<i64: 1, 16, 128>}, {transform_indices = @transform_6, window_bounds = array<i64: 1, 16, 128>}]} {
    %c0 = arith.constant 0 : index
    %c0_0 = arith.constant 0 : index
    %c0_1 = arith.constant 0 : index
    %0 = vector.load %arg1[%c0, %c0_0, %c0_1] : memref<1x16x128xbf16, #tpu.memory_space<vmem>>, vector<1x16x128xbf16>
    %c0_2 = arith.constant 0 : index
    %c0_3 = arith.constant 0 : index
    %c0_4 = arith.constant 0 : index
    %1 = vector.load %arg2[%c0_2, %c0_3, %c0_4] : memref<1x128x128xbf16, #tpu.memory_space<vmem>>, vector<1x128x128xbf16>
    %c0_5 = arith.constant 0 : index
    %c0_6 = arith.constant 0 : index
    %2 = vector.load %arg5[%c0_5, %c0_6] : memref<3x128xf32, #tpu.memory_space<vmem>>, vector<1x128xf32>
    %c1 = arith.constant 1 : index
    %c0_7 = arith.constant 0 : index
    %3 = vector.load %arg5[%c1, %c0_7] : memref<3x128xf32, #tpu.memory_space<vmem>>, vector<1x128xf32>
    %c2 = arith.constant 2 : index
    %c0_8 = arith.constant 0 : index
    %4 = vector.load %arg5[%c2, %c0_8] : memref<3x128xf32, #tpu.memory_space<vmem>>, vector<1x128xf32>
    %5 = arith.extf %1 : vector<1x128x128xbf16> to vector<1x128x128xf32>
    %6 = vector.shape_cast %4 : vector<1x128xf32> to vector<1x1x128xf32>
    %7 = vector.broadcast %6 : vector<1x1x128xf32> to vector<1x128x128xf32>
    %8 = arith.mulf %5, %7 : vector<1x128x128xf32>
    %9 = arith.truncf %8 : vector<1x128x128xf32> to vector<1x128x128xbf16>
    %cst = arith.constant dense<0.000000e+00> : vector<1x16x128xf32>
    %10 = tpu.matmul %0, %9, %cst {dimension_numbers = #tpu.dot_dimension_numbers<[2], [2], [1], [1], [0, 0, 0, 1, 1, 1], [0], [0]>} : vector<1x16x128xbf16>, vector<1x128x128xbf16>, vector<1x16x128xf32> -> vector<1x16x128xf32>
    %cst_9 = arith.constant dense<0.000000e+00> : vector<1x128x16xf32>
    %11 = tpu.matmul %9, %0, %cst_9 {dimension_numbers = #tpu.dot_dimension_numbers<[2], [2], [1], [1], [0, 0, 0, 1, 1, 1], [0], [0]>} : vector<1x128x128xbf16>, vector<1x16x128xbf16>, vector<1x128x16xf32> -> vector<1x128x16xf32>
    %12 = arith.extf %0 : vector<1x16x128xbf16> to vector<1x16x128xf32>
    %13 = vector.shape_cast %3 : vector<1x128xf32> to vector<1x1x128xf32>
    %14 = vector.broadcast %13 : vector<1x1x128xf32> to vector<1x16x128xf32>
    %15 = arith.mulf %12, %14 : vector<1x16x128xf32>
    %cst_10 = arith.constant dense<0.000000e+00> : vector<1x16xf32>
    %16 = vector.multi_reduction <add>, %15, %cst_10 [2] : vector<1x16x128xf32> to vector<1x16xf32>
    %17 = vector.shape_cast %16 : vector<1x16xf32> to vector<1x1x16xf32>
    %18 = arith.extf %1 : vector<1x128x128xbf16> to vector<1x128x128xf32>
    %19 = vector.shape_cast %2 : vector<1x128xf32> to vector<1x1x128xf32>
    %20 = vector.broadcast %19 : vector<1x1x128xf32> to vector<1x128x128xf32>
    %21 = arith.mulf %18, %20 : vector<1x128x128xf32>
    %cst_11 = arith.constant dense<0.000000e+00> : vector<1x128xf32>
    %22 = vector.multi_reduction <add>, %21, %cst_11 [2] : vector<1x128x128xf32> to vector<1x128xf32>
    %23 = vector.shape_cast %22 : vector<1x128xf32> to vector<1x1x128xf32>
    %c0_12 = arith.constant 0 : index
    %c0_13 = arith.constant 0 : index
    %c0_14 = arith.constant 0 : index
    %24 = vector.load %arg4[%c0_12, %c0_13, %c0_14] : memref<1x1x128xf32, #tpu.memory_space<vmem>>, vector<1x1x128xf32>
    %25 = arith.addf %23, %24 : vector<1x1x128xf32>
    %c0_15 = arith.constant 0 : index
    %c0_16 = arith.constant 0 : index
    %c0_17 = arith.constant 0 : index
    %26 = vector.load %arg3[%c0_15, %c0_16, %c0_17] : memref<1x1x16xf32, #tpu.memory_space<vmem>>, vector<1x1x16xf32>
    %27 = arith.addf %17, %26 : vector<1x1x16xf32>
    %28 = vector.broadcast %25 : vector<1x1x128xf32> to vector<1x16x128xf32>
    %29 = arith.addf %10, %28 : vector<1x16x128xf32>
    %cst_18 = arith.constant dense<0xFF800000> : vector<1x16xf32>
    %30 = vector.multi_reduction <maximumf>, %29, %cst_18 [2] : vector<1x16x128xf32> to vector<1x16xf32>
    %31 = vector.shape_cast %30 : vector<1x16xf32> to vector<1x16x1xf32>
    %32 = vector.broadcast %31 : vector<1x16x1xf32> to vector<1x16x128xf32>
    %33 = arith.subf %29, %32 : vector<1x16x128xf32>
    %34 = math.exp %33 : vector<1x16x128xf32>
    %cst_19 = arith.constant dense<0.000000e+00> : vector<1x16xf32>
    %35 = vector.multi_reduction <add>, %34, %cst_19 [2] : vector<1x16x128xf32> to vector<1x16xf32>
    %36 = vector.shape_cast %35 : vector<1x16xf32> to vector<1x16x1xf32>
    %37 = tpu.reciprocal %36 {approx = true} : vector<1x16x1xf32> -> vector<1x16x1xf32>
    %38 = vector.broadcast %37 : vector<1x16x1xf32> to vector<1x16x128xf32>
    %39 = arith.mulf %34, %38 : vector<1x16x128xf32>
    %40 = vector.broadcast %27 : vector<1x1x16xf32> to vector<1x128x16xf32>
    %41 = arith.addf %11, %40 : vector<1x128x16xf32>
    %cst_20 = arith.constant dense<0xFF800000> : vector<1x128xf32>
    %42 = vector.multi_reduction <maximumf>, %41, %cst_20 [2] : vector<1x128x16xf32> to vector<1x128xf32>
    %43 = vector.shape_cast %42 : vector<1x128xf32> to vector<1x128x1xf32>
    %44 = vector.broadcast %43 : vector<1x128x1xf32> to vector<1x128x16xf32>
    %45 = arith.subf %41, %44 : vector<1x128x16xf32>
    %46 = math.exp %45 : vector<1x128x16xf32>
    %cst_21 = arith.constant dense<0.000000e+00> : vector<1x128xf32>
    %47 = vector.multi_reduction <add>, %46, %cst_21 [2] : vector<1x128x16xf32> to vector<1x128xf32>
    %48 = vector.shape_cast %47 : vector<1x128xf32> to vector<1x128x1xf32>
    %49 = tpu.reciprocal %48 {approx = true} : vector<1x128x1xf32> -> vector<1x128x1xf32>
    %50 = vector.broadcast %49 : vector<1x128x1xf32> to vector<1x128x16xf32>
    %51 = arith.mulf %46, %50 : vector<1x128x16xf32>
    %52 = arith.truncf %39 : vector<1x16x128xf32> to vector<1x16x128xbf16>
    %cst_22 = arith.constant dense<0.000000e+00> : vector<1x16x128xf32>
    %53 = tpu.matmul %52, %1, %cst_22 {dimension_numbers = #tpu.dot_dimension_numbers<[2], [1], [1], [2], [0, 0, 0, 1, 1, 2], [0], [0]>} : vector<1x16x128xbf16>, vector<1x128x128xbf16>, vector<1x16x128xf32> -> vector<1x16x128xf32>
    %54 = arith.truncf %51 : vector<1x128x16xf32> to vector<1x128x16xbf16>
    %cst_23 = arith.constant dense<0.000000e+00> : vector<1x128x128xf32>
    %55 = tpu.matmul %54, %0, %cst_23 {dimension_numbers = #tpu.dot_dimension_numbers<[2], [1], [1], [2], [0, 0, 0, 1, 1, 2], [0], [0]>} : vector<1x128x16xbf16>, vector<1x16x128xbf16>, vector<1x128x128xf32> -> vector<1x128x128xf32>
    %56 = arith.truncf %55 : vector<1x128x128xf32> to vector<1x128x128xbf16>
    %cst_24 = arith.constant dense<0.000000e+00> : vector<1x16x128xf32>
    %57 = tpu.matmul %52, %56, %cst_24 {dimension_numbers = #tpu.dot_dimension_numbers<[2], [1], [1], [2], [0, 0, 0, 1, 1, 2], [0], [0]>} : vector<1x16x128xbf16>, vector<1x128x128xbf16>, vector<1x16x128xf32> -> vector<1x16x128xf32>
    %c0_25 = arith.constant 0 : index
    %c0_26 = arith.constant 0 : index
    %c0_27 = arith.constant 0 : index
    %58 = vector.load %arg6[%c0_25, %c0_26, %c0_27] : memref<1x16x128xf32, #tpu.memory_space<vmem>>, vector<1x16x128xf32>
    tpu.vector_store %arg6[%c0_25, %c0_26, %c0_27], %53 {strides = array<i32>} : memref<1x16x128xf32, #tpu.memory_space<vmem>>, vector<1x16x128xf32>,
    %c0_28 = arith.constant 0 : index
    %c0_29 = arith.constant 0 : index
    %c0_30 = arith.constant 0 : index
    %59 = vector.load %arg7[%c0_28, %c0_29, %c0_30] : memref<1x16x128xf32, #tpu.memory_space<vmem>>, vector<1x16x128xf32>
    tpu.vector_store %arg7[%c0_28, %c0_29, %c0_30], %57 {strides = array<i32>} : memref<1x16x128xf32, #tpu.memory_space<vmem>>, vector<1x16x128xf32>,
    return
  }
  func.func @transform_0(%arg0: i32) -> (i32, i32, i32) {
    %c0_i32 = arith.constant 0 : i32
    %c0_i32_0 = arith.constant 0 : i32
    %c0_i32_1 = arith.constant 0 : i32
    return %arg0, %c0_i32, %c0_i32_0 : i32, i32, i32
  }
  func.func @transform_1(%arg0: i32) -> (i32, i32, i32) {
    %c0_i32 = arith.constant 0 : i32
    %c0_i32_0 = arith.constant 0 : i32
    %c0_i32_1 = arith.constant 0 : i32
    return %arg0, %c0_i32, %c0_i32_0 : i32, i32, i32
  }
  func.func @transform_2(%arg0: i32) -> (i32, i32, i32) {
    %c0_i32 = arith.constant 0 : i32
    %c0_i32_0 = arith.constant 0 : i32
    %c0_i32_1 = arith.constant 0 : i32
    return %arg0, %c0_i32, %c0_i32_0 : i32, i32, i32
  }
  func.func @transform_3(%arg0: i32) -> (i32, i32, i32) {
    %c0_i32 = arith.constant 0 : i32
    %c0_i32_0 = arith.constant 0 : i32
    %c0_i32_1 = arith.constant 0 : i32
    return %arg0, %c0_i32, %c0_i32_0 : i32, i32, i32
  }
  func.func @transform_4(%arg0: i32) -> (i32, i32) {
    %c0_i32 = arith.constant 0 : i32
    %c0_i32_0 = arith.constant 0 : i32
    %c0_i32_1 = arith.constant 0 : i32
    return %c0_i32, %c0_i32_0 : i32, i32
  }
  func.func @transform_5(%arg0: i32) -> (i32, i32, i32) {
    %c0_i32 = arith.constant 0 : i32
    %c0_i32_0 = arith.constant 0 : i32
    %c0_i32_1 = arith.constant 0 : i32
    return %arg0, %c0_i32, %c0_i32_0 : i32, i32, i32
  }
  func.func @transform_6(%arg0: i32) -> (i32, i32, i32) {
    %c0_i32 = arith.constant 0 : i32
    %c0_i32_0 = arith.constant 0 : i32
    %c0_i32_1 = arith.constant 0 : i32
    return %arg0, %c0_i32, %c0_i32_0 : i32, i32, i32
  }
}

</mosaic_0001>

<bundles_post_ra>
// kernel: tpu_custom_call.1
= control target key start
LH: loop header
LB: loop body
LE: loop exit
PB: predicated region body
PF: predicated region fallthrough
CT: control target
= control target key end

     0   :  { %s2873_s0 = inlined_call_operand.hbm [shape: bf16[2,16,128], index: 0, kind: input, shape index: {}]   ;;  %s2874_s1 = inlined_call_operand.hbm [shape: bf16[2,128,128], index: 1, kind: input, shape index: {}]   ;;  %s2875_s2 = inlined_call_operand.hbm [shape: f32[2,1,16], index: 2, kind: input, shape index: {}]   ;;  %s2876_s3 = inlined_call_operand.vmem [shape: f32[2,1,128], index: 3, kind: input, shape index: {}]   ;;  %s2877_s4 = inlined_call_operand.hbm [shape: f32[3,128], index: 4, kind: input, shape index: {}]   ;;  %s2878_s5 = inlined_call_operand.hbm [shape: f32[2,16,128], index: 5, kind: output, shape index: {0}]   ;;  %s2879_s6 = inlined_call_operand.hbm [shape: f32[2,16,128], index: 6, kind: output, shape index: {1}]  }
   0x1   :  { %2885 = sst [smem:[#allocation21_spill]] %s2874_s1 }
   0x2   :  { %2886 = sst [smem:[#allocation22_spill]] %s2877_s4 }
   0x3   :  { %12 = vsyncpa [#allocation3], 0 }
   0x4   :  { %14 = vsyncpa [#allocation3 + $0x1], 0 }
   0x5   :  { %15 = vsyncpa [#allocation6], 0 }
   0x6   :  { %17 = vsyncpa [#allocation6 + $0x1], 0 }
   0x7   :  { %18 = vsyncpa [#allocation9], 0 }
   0x8   :  { %19 = vsyncpa [#allocation4], 0 }
   0x9   :  { %21 = vsyncpa [#allocation4 + $0x1], 0 }
   0xa   :  { %22 = vsyncpa [#allocation12], 0 }
   0xb   :  { %24 = vsyncpa [#allocation12 + $0x1], 0  ;;  %s2144_s21 = smov 0   ;;  %s2146_s22 = smov 0  }
   0xc   :  { %s2148_s23 = smov 0   ;;  %s2150_s24 = smov 0  }
   0xd LB: > { %2887 = sst [smem:[#allocation18_spill]] %s2097_s23  ;;  %s2165_s25 = sadd.s32 1, %s2101_s24   ;;  %s2101_s24 = sphi %s2150_s24, %s2900_s24   ;;  %s2097_s23 = sphi %s2148_s23, %s2902_s23   ;;  %s2093_s22 = sphi %s2146_s22, %s2904_s22   ;;  %s2089_s21 = sphi %s2144_s21, %s2903_s21  }
   0xe   : > { %2888 = sst [smem:[#allocation19_spill]] %s2165_s25  ;;  %s37_s26 = sadd.s32 1, %s2097_s23 }
   0xf   : > { %s34_s27 = ssub.s32 %s2101_s24, %s2165_s25  ;;  %p44_p0 = scmp.ne.s32.totalorder %s2097_s23, %s2093_s22 }
  0x10   : > { %p35_p1 = scmp.eq.s32.totalorder %s34_s27, 0  ;;  %p45_p2 = scmp.eq.s32.totalorder %s2101_s24, 0 }
  0x11   : > { %p1736_p4 = scmp.lt.s32.totalorder %s2101_s24, 2  ;;  %s2182_s29 = sand.u32 1, %s2097_s23  }
  0x12   : > { %s2176_s28 = scalar_select %p35_p1, %s2097_s23, %s37_s26  }
  0x13   : > { %p46_p5 = por %p45_p2, %p44_p0  ;;  %s259_s7 = sand.u32 1, %s2101_s24  }
  0x14   : > { %2889 = sst [smem:[#allocation20_spill]] %s2176_s28  ;;  %s1625_s8 = sshll.u32 %s2182_s29, 6 }
  0x15   : > { %p2184_p6 = pnand %p1736_p4, %p46_p5  ;;  %s1687_s9 = sshll.u32 %s2101_s24, 6 }
  0x16   : > { %s263_s10 = scalar_lea.vmem [#allocation5], %s1625_s8  ;;  %s2891_s1 = sld [smem:[#allocation21_spill]] }
  0x17   : > { %s271_s11 = sshll.u32 %s263_s10, 4  ;;  %s2194_s16 = scalar_lea.sflag [#allocation6], %s259_s7  ;;  %s272_s11 = int_to_ptr.vmem [resolvable:$true] %s271_s11 }
  0x18   : > { %p1879_p8 = pneg %p2184_p6 }
  0x1c   : > { %s268_s14 = scalar_lea.hbm %s2891_s1, %s1687_s9  ;;  %s1882_s26 = scalar_lea.hbm %s2891_s1, 128 }
  0x1d   : > { %s269_s15 = sshll.u32 %s268_s14, 4  ;;  %s270_s15 = int_to_ptr.hbm [resolvable:$true] %s269_s15 }
  0x1e   : > { %s1875_s17 = sshra.s32 %s270_s15, 4  ;;  %s1876_s17 = int_to_ptr.hbm [resolvable:$true] %s1875_s17 }
  0x1f   : > { %s1877_s18 = scalar_lea.hbm %s1876_s17, 64  ;;  %p1883_p11 = scmp.lt.s32.totalorder %s1876_s17, %s2891_s1 }
  0x20   : > { %p1878_p7 = scmp.ne.s32.totalorder %s1876_s17, %s1877_s18  ;;  %p1884_p12 = scmp.lt.s32.totalorder %s1882_s26, %s1877_s18 }
  0x22   : > { %p1880_p9 = pnand %p1879_p8, %p1878_p7  ;;  %p1885_p13 = por %p1884_p12, %p1883_p11 }
  0x24   : > { %p1881_p10 = pneg %p1880_p9 }
  0x26   : > { %p1886_p1 = pnand %p1885_p13, %p1881_p10 }
  0x28   : > { %1889 = shalt.err (!%p1886_p1)
}
  0x29   : > { %s2880_s7 = smov 64   ;;  %s2881_s9 = smov 4  }
  0x2a   : > { %1724 = dma.hbm_to_vmem [thread:$0]  (!%p2184_p6), %s270_s15, 1024, %s272_s11, %s2194_s16, %s2880_s7, %s2880_s7, %s2881_s9  }
  0x2b   : > { %s2214_s10 = sadd.s32 4294967295, %s2101_s24   ;;  %s1618_s12 = sadd.s32 4294967294, %s2101_s24  }
  0x2c   : > { %p50_p2 = scmp.ne.s32.totalorder %s2093_s22, %s2089_s21  ;;  %p51_p4 = scmp.eq.s32.totalorder %s2214_s10, 0 }
  0x2d   : > { %p173_p5 = scmp.eq.s32.totalorder %s2214_s10, 1  ;;  %p179_p7 = scmp.eq.s32.totalorder %s1618_s12, 1 }
  0x2e   : > { %p2223_p9 = por %p51_p4, %p50_p2  ;;  %p1619_p10 = scmp.ge.s32.totalorder %s2101_s24, 1 }
  0x2f   : > { %p2231_p11 = por %p173_p5, %p44_p0  ;;  %p2235_p12 = por %p179_p7, %p50_p2 }
  0x30   : > { %p212_p13 = scmp.lt.s32.totalorder %s2101_s24, 3  ;;  %s2895_s4 = sld [smem:[#allocation22_spill]] }
  0x31   : > { %s2105_s20 = smov [#allocation8]   ;;  %s1622_s27 = sshll.u32 %s2182_s29, 3 }
  0x32   : > { %p2243_p1 = pnand %p1619_p10, %p212_p13  ;;  %s226_s26 = sshll.u32 %s2105_s20, 4  ;;  %s227_s26 = int_to_ptr.vmem [resolvable:$true] %s226_s26 }
  0x33   : > { %s1686_s8 = sshll.u32 %s2101_s24, 3  ;;  %s241_s7 = scalar_lea.vmem [#allocation2], %s1622_s27 }
  0x34   : > { %p1714_p0 = pneg %p2243_p1  ;;  %s246_s17 = scalar_lea.hbm %s2873_s0, %s1686_s8 }
  0x35   : > { %s249_s9 = sshll.u32 %s241_s7, 4  ;;  %s247_s1 = sshll.u32 %s246_s17, 4  ;;  %s248_s1 = int_to_ptr.hbm [resolvable:$true] %s247_s1  ;;  %s250_s9 = int_to_ptr.vmem [resolvable:$true] %s249_s9 }
  0x36   : > { %s224_s18 = sshll.u32 %s2895_s4, 4  ;;  %p1715_p2 = pnand %p1714_p0, %p51_p4  ;;  %s225_s18 = int_to_ptr.hbm [resolvable:$true] %s224_s18 }
  0x37   : > { %s238_s4 = scalar_lea.sflag [#allocation3], %s2182_s29  ;;  %s1935_s20 = sshra.s32 %s248_s1, 4  ;;  %s1936_s20 = int_to_ptr.hbm [resolvable:$true] %s1935_s20 }
  0x38   : > { %1717 = dma.hbm_to_vmem [thread:$0]  (!%p1715_p2), %s225_s18, 64, %s227_s26, [#allocation9]  }
  0x39   : > { %s1937_s28 = scalar_lea.hbm %s1936_s20, 8  ;;  %s1942_s12 = scalar_lea.hbm %s2873_s0, 16 }
  0x3a   : > { %p1938_p5 = scmp.ne.s32.totalorder %s1936_s20, %s1937_s28  ;;  %p1943_p13 = scmp.lt.s32.totalorder %s1936_s20, %s2873_s0 }
  0x3b   : > { %p1944_p0 = scmp.lt.s32.totalorder %s1942_s12, %s1937_s28 }
  0x3c   : > { %p1940_p7 = pnand %p1938_p5, %p1879_p8 }
  0x3d   : > { %p1945_p2 = por %p1944_p0, %p1943_p13 }
  0x3e   : > { %p1941_p10 = pneg %p1940_p7 }
  0x40   : > { %p1946_p3 = pnand %p1945_p2, %p1941_p10 }
  0x42   : > { %1949 = shalt.err (!%p1946_p3)
}
  0x43   : > { %s2897_s7 = smov 4   ;;  %s2898_s18 = smov 64  }
  0x44   : > { %1721 = dma.hbm_to_vmem [thread:$0]  (!%p2184_p6), %s248_s1, 128, %s250_s9, %s238_s4, %s2898_s18, %s2898_s18, %s2897_s7  }
  0x45   : > { %s287_s25 = scalar_lea.hbm %s2875_s2, %s2101_s24  ;;  %s284_s17 = scalar_lea.vmem [#allocation7], %s2182_s29 }
  0x46   : > { %s289_s15 = sshll.u32 %s287_s25, 4  ;;  %s291_s20 = sshll.u32 %s284_s17, 4  ;;  %s290_s15 = int_to_ptr.hbm [resolvable:$true] %s289_s15  ;;  %s292_s20 = int_to_ptr.vmem [resolvable:$true] %s291_s20 }
  0x47   : > { %s1965_s28 = sshra.s32 %s290_s15, 4  ;;  %s1972_s1 = scalar_lea.hbm %s2875_s2, 2  ;;  %s1966_s28 = int_to_ptr.hbm [resolvable:$true] %s1965_s28 }
  0x48   : > { %s1967_s12 = scalar_lea.hbm %s1966_s28, 1  ;;  %p1973_p10 = scmp.lt.s32.totalorder %s1966_s28, %s2875_s2 }
  0x49   : > { %p1968_p3 = scmp.ne.s32.totalorder %s1966_s28, %s1967_s12  ;;  %p1974_p13 = scmp.lt.s32.totalorder %s1972_s1, %s1967_s12 }
  0x4b   : > { %p1970_p5 = pnand %p1968_p3, %p1879_p8  ;;  %p1975_p0 = por %p1974_p13, %p1973_p10 }
  0x4d   : > { %p1971_p7 = pneg %p1970_p5 }
  0x4f   : > { %p1976_p2 = pnand %p1975_p0, %p1971_p7 }
  0x51   : > { %1979 = shalt.err (!%p1976_p2)
}
  0x52   : > { %1727 = dma.hbm_to_vmem [thread:$0]  (!%p2184_p6), %s290_s15, 16, %s292_s20, %s2194_s16  }
  0x53   : > { %306 = sbr.rel (%p2243_p1) target bundleno = 1338 (0x53a), region = 40  ;;  %s2291_s29 = sand.u32 (!%p2243_p1), 1, %s2093_s22  }
  0x54   : > { %s1629_s7 = sshll.u32 (!%p2243_p1), %s2291_s29, 3  ;;  %s309_s18 = scalar_lea.sflag (!%p2243_p1), [#allocation3], %s2291_s29 }
  0x55   : > { %s312_s26 = scalar_lea.vmem (!%p2243_p1), [#allocation2], %s1629_s7 }
  0x58   : > { %2068 = dma.done.wait (%p2223_p9), %s309_s18, 128  }
  0x59   : > { %2070 = vsyncadd (%p2223_p9), %s309_s18, 4294967168  ;;  %s318_s30 = sand.u32 1, %s2214_s10   ;;  %s1630_s16 = sshll.u32 %s2291_s29, 6 }
  0x5a   : > { %s319_s19 = scalar_lea.sflag [#allocation6], %s318_s30  ;;  %s2301_s23 = scalar_lea.vmem [#allocation5], %s1630_s16 }
  0x5b   : > { %2072 = dma.done.wait (%p2223_p9), %s319_s19, 1040  }
  0x5c   : > { %2074 = vsyncadd (%p2223_p9), %s319_s19, 4294966256  ;;  %s331_s25 = scalar_lea.vmem [#allocation7], %s2291_s29 }
  0x5d   : > { %2076 = dma.done.wait (%p51_p4), [#allocation9], 64  }
  0x5e   : > { %2078 = vsyncadd (%p51_p4), [#allocation9], 4294967232  ;;  %v518_v0 = vlaneseq  ;;  %p383_p6 = scmp.lt.s32.totalorder %s2214_s10, 1  ;;  %v2322_v2 = vld [vmem:[%s2301_s23] sm:$0xff]   ;;  %v2324_v3 = vld [vmem:[%s331_s25] ss:$0 sm:$0xff] }
  0x5f   : > { %v408_v4 = vunpack.c.l.bf16 %v2322_v2  ;;  %v2327_v5 = vld [vmem:[#allocation8] ss:$0 sm:$0xff]  ;;  %v387_v6 = vld [vmem:[%s312_s26] sm:$0xff]   ;;  %v1801_v8 = vld [vmem:[#allocation8 + $0x1] ss:$0 sm:$0xff]  ;;  %v409_v50 = vunpack.c.h.bf16 %v2322_v2  ;;  %vm788_vm0 = vcmask 130112  }
  0x60   : > { %v2314_v1 = vshrl.u32 %v518_v0, 7  ;;  %s2319_s13 = scalar_select %p383_p6, %s2214_s10, 1  ;;  %v457_v7 = vunpack.c.l.bf16 %v387_v6  ;;  %v2336_v10 = vld [vmem:[%s312_s26] sm:$0xff]  ;;  %v2341_v12 = vld [vmem:[#allocation8 + $0x2] ss:$0 sm:$0xff]  ;;  %v2344_v13 = vld [vmem:[%s2301_s23 + $0x8] sm:$0xff]   ;;  %v458_v19 = vunpack.c.h.bf16 %v387_v6 }
  0x61   : > { %v467_v9 = vmul.f32 %v2327_v5, %v408_v4  ;;  %1699 = vmatpush.bf16.xpose.msra.mxu1 %v2336_v10  ;;  %1292 = vmatpush.bf16.msra.mxu3 %v2336_v10  ;;  %v410_v14 = vunpack.c.l.bf16 %v2344_v13  ;;  %v411_v15 = vunpack.c.h.bf16 %v2344_v13  ;;  %v2352_v20 = vld [vmem:[%s2301_s23 + $0x38] sm:$0xff]   ;;  %v2355_v21 = vld [vmem:[%s2301_s23 + $0x10] sm:$0xff]   ;;  %v468_v57 = vmul.f32 %v2327_v5, %v409_v50  ;;  %v2408_v62 = vld [vmem:[%s2301_s23 + $0x28] sm:$0xff]   ;;  %s1632_s8 = sshll.u32 %s2291_s29, 4  ;;  %s1697_s27 = sshll.u32 %s2214_s10, 4 }
  0x62   : > { %1777 = vset.pattern.permute.xlu1 %v2314_v1  ;;  %1779 = vset.pattern.permute.xlu2 %v2314_v1  ;;  %s385_s20 = scalar_lea.vmem %s2876_s3, %s2319_s13  ;;  %v460_v11 = vmul.f32 %v1801_v8, %v457_v7  ;;  %v526_v18 = vadd.s32 8, %v2314_v1  ;;  %v422_v22 = vunpack.c.l.bf16 %v2352_v20  ;;  %v423_v23 = vunpack.c.h.bf16 %v2352_v20  ;;  %v2390_v47 = vld [vmem:[%s2301_s23 + $0x30] sm:$0xff]   ;;  %v395_v54 = vld [vmem:[%s2301_s23 + $0x18] sm:$0xff]   ;;  %s375_s1 = scalar_lea.vmem [#allocation10], %s1632_s8 }
  0x63   : > { %483 = vadd.xlane.f32.xlu2 %v467_v9  ;;  %v427_v16 = vmul.f32 %v2341_v12, %v410_v14  ;;  %v428_v17 = vmul.f32 %v2341_v12, %v411_v15  ;;  %v461_v26 = vmul.f32 %v1801_v8, %v458_v19  ;;  %v412_v31 = vunpack.c.l.bf16 %v2355_v21  ;;  %v2383_v41 = vld [vmem:[%s385_s20] ss:$0 sm:$0xff]  ;;  %s1433_s7 = scalar_lea.hbm %s2878_s5, %s1697_s27  ;;  %s1434_s18 = sshll.u32 %s375_s1, 4  ;;  %s1435_s18 = int_to_ptr.vmem [resolvable:$true] %s1434_s18 }
  0x64   : > { %462 = vadd.xlane.f32.xlu0 %v460_v11  ;;  %v439_v27 = vmul.f32 %v2341_v12, %v422_v22  ;;  %v440_v28 = vmul.f32 %v2341_v12, %v423_v23  ;;  %v413_v32 = vunpack.c.h.bf16 %v2355_v21  ;;  %v420_v48 = vunpack.c.l.bf16 %v2390_v47  ;;  %s1436_s26 = sshll.u32 %s1433_s7, 4  ;;  %s1417_s30 = scalar_lea.sflag [#allocation4], %s2291_s29  ;;  %s1437_s26 = int_to_ptr.hbm [resolvable:$true] %s1436_s26 }
  0x65   : > { %v443_v24 = vpack.c.bf16 %v427_v16, %v427_v16  ;;  %v444_v25 = vpack.c.bf16 %v428_v17, %v428_v17  ;;  %v429_v38 = vmul.f32 %v2341_v12, %v412_v31  ;;  %v421_v49 = vunpack.c.h.bf16 %v2390_v47  ;;  %s2009_s16 = sshra.s32 %s1437_s26, 4  ;;  %s2015_s13 = scalar_lea.hbm %s2878_s5, 32  ;;  %s2010_s16 = int_to_ptr.hbm [resolvable:$true] %s2009_s16 }
  0x66   : > { %v455_v33 = vpack.c.bf16 %v439_v27, %v439_v27  ;;  %v456_v34 = vpack.c.bf16 %v440_v28, %v440_v28  ;;  %v430_v39 = vmul.f32 %v2341_v12, %v413_v32  ;;  %v469_v51 = vmul.f32 %v2327_v5, %v410_v14  ;;  %s2011_s19 = scalar_lea.hbm %s2010_s16, 16  ;;  %p2016_p1 = scmp.lt.s32.totalorder %s2010_s16, %s2878_s5 }
  0x67   : > { %v689_v29 = vunpack.c.l.b16 %v443_v24  ;;  %v690_v30 = vunpack.c.l.b16 %v444_v25  ;;  %v445_v42 = vpack.c.bf16 %v429_v38, %v429_v38  ;;  %v437_v52 = vmul.f32 %v2341_v12, %v420_v48  ;;  %p2012_p8 = scmp.ne.s32.totalorder %s2010_s16, %s2011_s19  ;;  %p2017_p3 = scmp.lt.s32.totalorder %s2015_s13, %s2011_s19 }
  0x68   : > { %v701_v36 = vunpack.c.l.b16 %v455_v33  ;;  %v702_v37 = vunpack.c.l.b16 %v456_v34  ;;  %v446_v43 = vpack.c.bf16 %v430_v39, %v430_v39  ;;  %v438_v53 = vmul.f32 %v2341_v12, %v421_v49 }
  0x69   : > { %v2367_v35 = vpack.c.b16 %v690_v30, %v689_v29  ;;  %v691_v44 = vunpack.c.l.b16 %v445_v42  ;;  %v453_v55 = vpack.c.bf16 %v437_v52, %v437_v52  ;;  %v414_v58 = vunpack.c.l.bf16 %v395_v54  ;;  %v2425_v29 = vld [vmem:[%s2301_s23 + $0x20] sm:$0xff]   ;;  %p2013_p4 = pnand %p2012_p8, %p2231_p11  ;;  %p2018_p5 = por %p2017_p3, %p2016_p1 }
  0x6a   : > { %653 = vperm.xlu1 %1777, %v2324_v3   ;;  %v2376_v40 = vpack.c.b16 %v702_v37, %v701_v36  ;;  %v692_v45 = vunpack.c.l.b16 %v446_v43  ;;  %v454_v56 = vpack.c.bf16 %v438_v53, %v438_v53  ;;  %v415_v61 = vunpack.c.h.bf16 %v395_v54 }
  0x6b   : > { %922 = vmatmul.bf16.vlgmr.msra.gmra.mxu1 %v2367_v35  ;;  %v699_v59 = vunpack.c.l.b16 %v453_v55  ;;  %v418_v6 = vunpack.c.l.bf16 %v2408_v62  ;;  %v419_v7 = vunpack.c.h.bf16 %v2408_v62  ;;  %v431_v8 = vmul.f32 %v2341_v12, %v414_v58  ;;  %p2014_p9 = pneg %p2013_p4 }
  0x6c   : > { %464 = vadd.xlane.f32.xlu0 %v461_v26  ;;  %859 = vmatpush.bf16.xpose.msra.mxu0 %v2376_v40  ;;  %v2387_v46 = vpack.c.b16 %v692_v45, %v691_v44  ;;  %v700_v60 = vunpack.c.l.b16 %v454_v56  ;;  %v432_v9 = vmul.f32 %v2341_v12, %v415_v61  ;;  %v470_v11 = vmul.f32 %v2327_v5, %v411_v15 }
  0x6d   : > { %v435_v13 = vmul.f32 %v2341_v12, %v418_v6  ;;  %v436_v14 = vmul.f32 %v2341_v12, %v419_v7  ;;  %v447_v16 = vpack.c.bf16 %v431_v8, %v431_v8  ;;  %v416_v30 = vunpack.c.l.bf16 %v2425_v29  ;;  %p2019_p7 = pnand %p2018_p5, %p2014_p9 }
  0x6e   : > { %v2410_v63 = vpack.c.b16 %v700_v60, %v699_v59  ;;  %v448_v17 = vpack.c.bf16 %v432_v9, %v432_v9  ;;  %v417_v33 = vunpack.c.h.bf16 %v2425_v29  ;;  %v532_v34 = vadd.s32 16, %v2314_v1 }
  0x6f   : > { %v452_v19 = vpack.c.bf16 %v436_v14, %v436_v14  ;;  %v693_v24 = vunpack.c.l.b16 %v447_v16  ;;  %v433_v36 = vmul.f32 %v2341_v12, %v416_v30  ;;  %v471_v45 = vmul.f32 %v2327_v5, %v412_v31 }
  0x70   : > { %v694_v25 = vunpack.c.l.b16 %v448_v17  ;;  %v434_v37 = vmul.f32 %v2341_v12, %v417_v33  ;;  %1780 = vset.pattern.permute.xlu0 %v532_v34  ;;  %v473_v52 = vmul.f32 %v2327_v5, %v414_v58  ;;  %v474_v53 = vmul.f32 %v2327_v5, %v415_v61 }
  0x71   : > { %v698_v27 = vunpack.c.l.b16 %v452_v19  ;;  %v449_v38 = vpack.c.bf16 %v433_v36, %v433_v36  ;;  %v538_v31 = vadd.s32 24, %v2314_v1  ;;  %v425_v54 = vmul.f32 %v2341_v12, %v408_v4 }
  0x72   : > { %1778 = vset.pattern.permute.xlu1 %v526_v18  ;;  %v451_v18 = vpack.c.bf16 %v435_v13, %v435_v13  ;;  %v706_v28 = vpack.c.b16 %v694_v25, %v693_v24  ;;  %v450_v39 = vpack.c.bf16 %v434_v37, %v434_v37  ;;  %v475_v56 = vmul.f32 %v2327_v5, %v416_v30 }
  0x73   : > { %v695_v42 = vunpack.c.l.b16 %v449_v38  ;;  %v550_v59 = vadd.s32 40, %v2314_v1  ;;  %v556_v2 = vadd.s32 48, %v2314_v1  ;;  %v574_v16 = vadd.s32 72, %v2314_v1 }
  0x74   : > { %487 = vadd.xlane.f32.xlu0 %v469_v51  ;;  %860 = vmatpush.bf16.xpose.msra.mxu0 %v2410_v63  ;;  %v697_v26 = vunpack.c.l.b16 %v451_v18  ;;  %v696_v43 = vunpack.c.l.b16 %v450_v39  ;;  %v544_v51 = vadd.s32 32, %v2314_v1  ;;  %v568_v24 = vadd.s32 64, %v2314_v1 }
  0x75   : > { %v477_v25 = vmul.f32 %v2327_v5, %v418_v6  ;;  %vm958_vm1 = vcmask 130048   ;;  %vm792_vm2 = vcmask 195712   ;;  %vm796_vm3 = vcmask 261312  }
  0x76   : > { %v708_v15 = vpack.c.b16 %v698_v27, %v697_v26  ;;  %v707_v44 = vpack.c.b16 %v696_v43, %v695_v42  ;;  %v476_v42 = vmul.f32 %v2327_v5, %v417_v33  ;;  %vm800_vm4 = vcmask 326912  }
  0x77   : > { %vm804_vm5 = vcmask 392512   ;;  %vm808_vm6 = vcmask 458112   ;;  %vm812_vm7 = vcmask 523712   ;;  %vm816_vm8 = vcmask 589312  }
  0x78   : > { %vm820_vm9 = vcmask 654912   ;;  %vm824_vm10 = vcmask 720512   ;;  %vm828_vm11 = vcmask 786112   ;;  %vm832_vm12 = vcmask 851712  }
  0x79   : > { %vm836_vm13 = vcmask 917312   ;;  %vm840_vm14 = vcmask 982912   ;;  %vm844_vm15 = vcmask 1048512  }
  0x7b   : > { %522 = vperm.xlu2 %1779, %v2383_v41   ;;  %927 = vmatmul.bf16.gmra.mxu1 %v2387_v46 }
  0x7c   : > { %489 = vadd.xlane.f32.xlu0 %v470_v11  ;;  %861 = vmatpush.bf16.xpose.msra.mxu0 %v708_v15 }
  0x84   : > { %862 = vmatpush.bf16.xpose.msra.mxu0 %v707_v44 }
  0x8b   : > { %932 = vmatmul.bf16.gmra.mxu1 %v706_v28 }
  0x8c   : > { %863 = vmatpush.bf16.xpose.msra.mxu0 %v706_v28 }
  0x90   : > { %534 = vperm.xlu0 %1780, %v2383_v41  }
  0x94   : > { %485 = vadd.xlane.f32.xlu1 %v468_v57  ;;  %864 = vmatpush.bf16.xpose.msra.mxu0 %v2387_v46  ;;  %v441_v46 = vpack.c.bf16 %v425_v54, %v425_v54  ;;  %v2106_v57 = vmov 0   ;;  %v580_v54 = vadd.s32 80, %v2314_v1 }
  0x95   : > { %1786 = vset.pattern.permute.xlu2 %v2106_v57 }
  0x96   : > { %v687_v58 = vunpack.c.l.b16 %v441_v46 }
  0x98   : > { %1782 = vset.pattern.permute.xlu0 %v544_v51 }
  0x9b   : > { %937 = vmatmul.bf16.gmra.mxu1 %v707_v44 }
  0x9c   : > { %865 = vmatpush.bf16.xpose.msra.mxu0 %v2367_v35 }
  0xa0   : > { %546 = vperm.xlu0 %1782, %v2383_v41  }
  0xa4   : > { %491 = vadd.xlane.f32.xlu2 %v471_v45  ;;  %v478_v45 = vmul.f32 %v2327_v5, %v419_v7 }
  0xa8   : > { %1783 = vset.pattern.permute.xlu0 %v550_v59 }
  0xab   : > { %942 = vmatmul.bf16.gmra.mxu1 %v708_v15 }
  0xac   : > { %495 = vadd.xlane.f32.xlu2 %v473_v52 }
  0xad   : > { %659 = vperm.xlu1 %1778, %v2324_v3   ;;  %v426_v3 = vmul.f32 %v2341_v12, %v409_v50  ;;  %v562_v12 = vadd.s32 56, %v2314_v1 }
  0xaf   : > { %v442_v55 = vpack.c.bf16 %v426_v3, %v426_v3 }
  0xb0   : > { %552 = vperm.xlu0 %1783, %v2383_v41  }
  0xb1   : > { %v688_v4 = vunpack.c.l.b16 %v442_v55 }
  0xb3   : > { %v703_v60 = vpack.c.b16 %v688_v4, %v687_v58 }
  0xb4   : > { %497 = vadd.xlane.f32.xlu2 %v474_v53 }
  0xb5   : > { %528 = vperm.xlu1 %1778, %v2383_v41   ;;  %866 = vmatpush.bf16.xpose.msra.mxu0 %v703_v60 }
  0xb8   : > { %1785 = vset.pattern.permute.xlu0 %v562_v12 }
  0xbb   : > { %947 = vmatmul.bf16.gmra.mxu1 %v2410_v63  ;;  %v472_v63 = vmul.f32 %v2327_v5, %v413_v32 }
  0xbc   : > { %499 = vadd.xlane.f32.xlu2 %v475_v56  ;;  %867 = vmatmul.bf16.vlgmr.msra.gmra.mxu0 %v2336_v10  ;;  %v2509_v56 = vand.u32 127, %v518_v0 }
  0xbd   : > { %1781 = vset.pattern.permute.xlu1 %v538_v31  ;;  %916 = vmatpush.bf16.xpose.msrb.mxu0 %v2336_v10 }
  0xbe   : > { %v2512_v4 = vadd.s32 4294967288, %v2509_v56 }
  0xc0   : > { %564 = vperm.xlu0 %1785, %v2383_v41  }
  0xc5   : > { %540 = vperm.xlu1 %1781, %v2383_v41  }
  0xc8   : > { %1788 = vset.pattern.permute.xlu0 %v574_v16 }
  0xcb   : > { %952 = vmatmul.bf16.gmra.mxu1 %v2376_v40 }
  0xcc   : > { %917 = vmatmul.bf16.vlgmr.msrb.gmra.mxu0 %v703_v60 }
  0xcd   : > { %1784 = vset.pattern.permute.xlu1 %v556_v2 }
  0xd0   : > { %576 = vperm.xlu0 %1788, %v2383_v41  }
  0xd6   : > { %v484_v10 = vpop.xlane.xlu2 %483 }
  0xd7   : > { %v463_v50 = vpop.xlane.xlu0 %462 }
  0xdc   : > { %v654_v35 = vpop.permute.xlu1 %653 }
  0xdd   : > { %v663_v61 = vadd.f32 %v654_v35, %v463_v50 }
  0xde   : > { %v523_v8 = vpop.permute.xlu2 %522 }
  0xdf   : > { %894 = vperm.xlu2 %1786, %v663_v61   ;;  %v2468_v9 = vadd.f32 %v523_v8, %v484_v10  ;;  %v465_v13 = vpop.xlane.xlu0 %464 }
  0xe7   : > { %v488_v17 = vpop.xlane.xlu0 %487 }
  0xe8   : > { %v2474_v21 = vpop.f32.mrf.mxu1 }
  0xef   : > { %493 = vadd.xlane.f32.xlu1 %v472_v63  ;;  %v490_v32 = vpop.xlane.xlu0 %489 }
  0xf0   : > { %v925_v26 = vpop.f32.mrf.mxu1 }
  0xf8   : > { %v928_v36 = vpop.f32.mrf.mxu1 }
  0xfa   : > { %505 = vadd.xlane.f32.xlu0 %v478_v45 }
 0x100   : > { %v930_v39 = vpop.f32.mrf.mxu1 }
 0x102   : > { %v535_v27 = vpop.permute.xlu0 %534 }
 0x103   : > { %v2481_v28 = vadd.f32 %v535_v27, %v488_v17 }
 0x107   : > { %v486_v11 = vpop.xlane.xlu1 %485 }
 0x108   : > { %558 = vperm.xlu1 %1784, %v2383_v41   ;;  %v933_v6 = vpop.f32.mrf.mxu1 }
 0x110   : > { %v935_v44 = vpop.f32.mrf.mxu1 }
 0x112   : > { %v547_v30 = vpop.permute.xlu0 %546 }
 0x117   : > { %v492_v15 = vpop.xlane.xlu2 %491 }
 0x118   : > { %v2483_v34 = vadd.f32 %v547_v30, %v492_v15  ;;  %v938_v33 = vpop.f32.mrf.mxu1 }
 0x11f   : > { %v660_v40 = vpop.permute.xlu1 %659  ;;  %v2490_v43 = vpop.xlane.xlu2 %495 }
 0x120   : > { %v664_v14 = vadd.f32 %v660_v40, %v465_v13  ;;  %v940_v62 = vpop.f32.mrf.mxu1 }
 0x122   : > { %897 = vperm.xlu2 %1786, %v664_v14   ;;  %v553_v53 = vpop.permute.xlu0 %552 }
 0x127   : > { %v529_v18 = vpop.permute.xlu1 %528  ;;  %v2497_v52 = vpop.xlane.xlu2 %497 }
 0x128   : > { %v2472_v19 = vadd.f32 %v529_v18, %v486_v11  ;;  %v943_v58 = vpop.f32.mrf.mxu1 }
 0x12a   : > { %1787 = vset.pattern.permute.xlu2 %v568_v24 }
 0x12f   : > { %v2505_v46 = vpop.xlane.xlu2 %499 }
 0x130   : > { %v945_v63 = vpop.f32.mrf.mxu1 }
 0x132   : > { %503 = vadd.xlane.f32.xlu1 %v477_v25  ;;  %v479_v25 = vmul.f32 %v2327_v5, %v420_v48 }
 0x137   : > { %v541_v37 = vpop.permute.xlu1 %540 }
 0x138   : > { %v2485_v38 = vadd.f32 %v541_v37, %v490_v32  ;;  %v948_v14 = vpop.f32.mrf.mxu1 }
 0x139   : > { %v2495_v51 = vpop.f32.mrf.mxu0  ;;  %v895_v55 = vpop.permute.xlu2 %894 }
 0x13a   : > { %v899_v60 = vperm.slane %v895_v55, %v2509_v56 }
 0x140   : > { %v950_v30 = vpop.f32.mrf.mxu1 }
 0x141   : > { %v2503_v3 = vpop.f32.mrf.mxu0 }
 0x149   : > { %v918_v7 = vpop.f32.mrf.mxu0 }
 0x14b   : > { %501 = vadd.xlane.f32.xlu2 %v476_v42  ;;  %v953_v42 = vpop.f32.mrf.mxu1 }
 0x151   : > { %v920_v12 = vpop.f32.mrf.mxu0 }
 0x162   : > { %v494_v31 = vpop.xlane.xlu1 %493 }
 0x163   : > { %570 = vperm.xlu2 %1787, %v2383_v41   ;;  %v2500_v29 = vadd.f32 %v553_v53, %v494_v31 }
 0x16b   : > { %1789 = vset.pattern.permute.xlu2 %v580_v54  ;;  %v2573_v54 = vpop.permute.xlu0 %564 }
 0x173   : > { %582 = vperm.xlu2 %1789, %v2383_v41  }
 0x17c   : > { %v898_v59 = vpop.permute.xlu2 %897 }
 0x17d   : > { %v900_v2 = vperm.slane %v898_v59, %v2512_v4  ;;  %v577_v59 = vpop.permute.xlu0 %576 }
 0x17f   : > { %v901_v35 = vsel %vm788_vm0, %v900_v2, %v899_v60 }
 0x180   : > { %v2517_v50 = vadd.f32 %v920_v12, %v901_v35  ;;  %v2519_v61 = vadd.f32 %v918_v7, %v901_v35  ;;  %v2525_v8 = vadd.f32 %v945_v63, %v901_v35  ;;  %v2527_v11 = vadd.f32 %v925_v26, %v901_v35 }
 0x181   : > { %v2533_v16 = vadd.f32 %v948_v14, %v901_v35  ;;  %v2535_v17 = vadd.f32 %v928_v36, %v901_v35  ;;  %v2541_v24 = vadd.f32 %v930_v39, %v901_v35  ;;  %v2548_v27 = vadd.f32 %v933_v6, %v901_v35 }
 0x182   : > { %v962_v0 = vsel %vm958_vm1, %v2517_v50, -inf  ;;  %v959_v10 = vsel %vm958_vm1, %v2519_v61, -inf  ;;  %v992_v13 = vsel %vm958_vm1, %v2525_v8, -inf  ;;  %v968_v40 = vsel %vm958_vm1, %v2527_v11, -inf }
 0x183   : > { %963 = vmax.xlane.f32.xlu1 %v962_v0  ;;  %960 = vmax.xlane.f32.xlu0 %v959_v10  ;;  %v995_v18 = vsel %vm958_vm1, %v2533_v16, -inf  ;;  %v971_v32 = vsel %vm958_vm1, %v2535_v17, -inf  ;;  %v974_v26 = vsel %vm958_vm1, %v2541_v24, -inf  ;;  %v2551_v15 = vadd.f32 %v2474_v21, %v901_v35  ;;  %v2589_v10 = vpop.permute.xlu1 %558 }
 0x184   : > { %v977_v36 = vsel %vm958_vm1, %v2548_v27, -inf  ;;  %v2557_v48 = vadd.f32 %v935_v44, %v901_v35  ;;  %v2559_v39 = vadd.f32 %v940_v62, %v901_v35  ;;  %v2565_v45 = vadd.f32 %v938_v33, %v901_v35  ;;  %v955_v62 = vpop.f32.mrf.mxu1 }
 0x185   : > { %v965_v37 = vsel %vm958_vm1, %v2551_v15, -inf  ;;  %v2567_v53 = vadd.f32 %v943_v58, %v901_v35  ;;  %v2575_v7 = vadd.f32 %v950_v30, %v901_v35  ;;  %v2577_v55 = vadd.f32 %v955_v62, %v901_v35 }
 0x186   : > { %v980_v6 = vsel %vm958_vm1, %v2557_v48, -inf  ;;  %v986_v21 = vsel %vm958_vm1, %v2559_v39, -inf  ;;  %v983_v31 = vsel %vm958_vm1, %v2565_v45, -inf  ;;  %v2583_v2 = vadd.f32 %v953_v42, %v901_v35  ;;  %v2598_v35 = vpop.xlane.xlu0 %505 }
 0x187   : > { %v989_v44 = vsel %vm958_vm1, %v2567_v53, -inf  ;;  %v998_v33 = vsel %vm958_vm1, %v2575_v7, -inf  ;;  %v1004_v58 = vsel %vm958_vm1, %v2577_v55, -inf }
 0x188   : > { %v1001_v0 = vsel %vm958_vm1, %v2583_v2, -inf }
 0x18b   : > { %993 = vmax.xlane.f32.xlu1 %v992_v13  ;;  %969 = vmax.xlane.f32.xlu0 %v968_v40 }
 0x193   : > { %996 = vmax.xlane.f32.xlu1 %v995_v18  ;;  %972 = vmax.xlane.f32.xlu0 %v971_v32  ;;  %v480_v18 = vmul.f32 %v2327_v5, %v421_v49 }
 0x19b   : > { %975 = vmax.xlane.f32.xlu0 %v974_v26 }
 0x19c   : > { %507 = vadd.xlane.f32.xlu2 %v479_v25 }
 0x1a3   : > { %978 = vmax.xlane.f32.xlu0 %v977_v36 }
 0x1a4   : > { %966 = vmax.xlane.f32.xlu2 %v965_v37 }
 0x1a5   : > { %v504_v13 = vpop.xlane.xlu1 %503 }
 0x1ab   : > { %981 = vmax.xlane.f32.xlu0 %v980_v6 }
 0x1ac   : > { %987 = vmax.xlane.f32.xlu2 %v986_v21 }
 0x1b3   : > { %984 = vmax.xlane.f32.xlu0 %v983_v31 }
 0x1b4   : > { %990 = vmax.xlane.f32.xlu2 %v989_v44 }
 0x1bb   : > { %999 = vmax.xlane.f32.xlu0 %v998_v33 }
 0x1bc   : > { %1005 = vmax.xlane.f32.xlu2 %v1004_v58 }
 0x1be   : > { %v502_v60 = vpop.xlane.xlu2 %501 }
 0x1bf   : > { %v2585_v12 = vadd.f32 %v577_v59, %v502_v60 }
 0x1c3   : > { %1002 = vmax.xlane.f32.xlu0 %v1001_v0 }
 0x1c6   : > { %v2591_v63 = vpop.permute.xlu2 %570 }
 0x1cb   : > { %509 = vadd.xlane.f32.xlu0 %v480_v18 }
 0x1ce   : > { %v583_v40 = vpop.permute.xlu2 %582 }
 0x1cf   : > { %v2593_v14 = vadd.f32 %v583_v40, %v504_v13  ;;  %v586_v40 = vadd.s32 88, %v2314_v1 }
 0x1d1   : > { %1790 = vset.pattern.permute.xlu1 %v586_v40 }
 0x1f6   : > { %v964_v32 = vpop.xlane.xlu1 %963  ;;  %v961_v25 = vpop.xlane.xlu0 %960 }
 0x1f7   : > { %v1008_v26 = vsub.f32 %v2517_v50, %v964_v32  ;;  %v1007_v30 = vsub.f32 %v2519_v61, %v961_v25 }
 0x1f9   : > { %v1025_v36 = vmul.f32 1.442695, %v1008_v26  ;;  %v1023_v37 = vmul.f32 1.442695, %v1007_v30 }
 0x1fb   : > { %1803 = vpow2.f32 %v1025_v36 }
 0x1fc   : > { %1805 = vpow2.f32 %v1023_v37 }
 0x1fe   : > { %v970_v42 = vpop.xlane.xlu0 %969 }
 0x1ff   : > { %v1010_v6 = vsub.f32 %v2527_v11, %v970_v42  ;;  %v994_v42 = vpop.xlane.xlu1 %993 }
 0x201   : > { %v2603_v21 = vpop.eup %1803  ;;  %v1029_v47 = vmul.f32 1.442695, %v1010_v6  ;;  %v598_v6 = vadd.s32 104, %v2314_v1 }
 0x202   : > { %v2605_v49 = vpop.eup %1805  ;;  %v1058_v31 = vsel %vm958_vm1, %v2603_v21, 0.0 }
 0x203   : > { %1059 = vadd.xlane.f32.xlu1 %v1058_v31  ;;  %v1055_v50 = vsel %vm958_vm1, %v2605_v49, 0.0  ;;  %1807 = vpow2.f32 %v1029_v47  ;;  %v604_v47 = vadd.s32 112, %v2314_v1  ;;  %1792 = vset.pattern.permute.xlu2 %v598_v6 }
 0x204   : > { %1056 = vadd.xlane.f32.xlu2 %v1055_v50 }
 0x205   : > { %1793 = vset.pattern.permute.xlu0 %v604_v47 }
 0x206   : > { %v973_v61 = vpop.xlane.xlu0 %972 }
 0x207   : > { %v1011_v44 = vsub.f32 %v2535_v17, %v973_v61 }
 0x209   : > { %v1031_v62 = vmul.f32 1.442695, %v1011_v44  ;;  %v2612_v33 = vpop.eup %1807 }
 0x20a   : > { %v1064_v11 = vsel %vm958_vm1, %v2612_v33, 0.0 }
 0x20b   : > { %1809 = vpow2.f32 %v1031_v62  ;;  %1065 = vadd.xlane.f32.xlu0 %v1064_v11  ;;  %v997_v11 = vpop.xlane.xlu1 %996 }
 0x20e   : > { %v976_v58 = vpop.xlane.xlu0 %975 }
 0x20f   : > { %v1012_v59 = vsub.f32 %v2541_v24, %v976_v58  ;;  %v2617_v60 = vpop.xlane.xlu2 %507 }
 0x211   : > { %v1033_v0 = vmul.f32 1.442695, %v1012_v59  ;;  %v2619_v13 = vpop.eup %1809 }
 0x212   : > { %v1067_v17 = vsel %vm958_vm1, %v2619_v13, 0.0 }
 0x213   : > { %1811 = vpow2.f32 %v1033_v0  ;;  %1068 = vadd.xlane.f32.xlu0 %v1067_v17 }
 0x216   : > { %v979_v18 = vpop.xlane.xlu0 %978 }
 0x217   : > { %v1013_v32 = vsub.f32 %v2548_v27, %v979_v18  ;;  %v967_v25 = vpop.xlane.xlu2 %966 }
 0x218   : > { %v1009_v26 = vsub.f32 %v2551_v15, %v967_v25 }
 0x219   : > { %v2626_v24 = vpop.eup %1811  ;;  %v1035_v30 = vmul.f32 1.442695, %v1013_v32  ;;  %v481_v32 = vmul.f32 %v2327_v5, %v422_v22 }
 0x21a   : > { %v1027_v36 = vmul.f32 1.442695, %v1009_v26  ;;  %v1070_v37 = vsel %vm958_vm1, %v2626_v24, 0.0 }
 0x21b   : > { %1813 = vpow2.f32 %v1035_v30  ;;  %1071 = vadd.xlane.f32.xlu2 %v1070_v37 }
 0x21c   : > { %1815 = vpow2.f32 %v1027_v36 }
 0x21e   : > { %v982_v30 = vpop.xlane.xlu0 %981 }
 0x21f   : > { %v988_v31 = vpop.xlane.xlu2 %987  ;;  %v1014_v22 = vsub.f32 %v2557_v48, %v982_v30 }
 0x220   : > { %v1016_v27 = vsub.f32 %v2559_v39, %v988_v31  ;;  %v1019_v39 = vsub.f32 %v2533_v16, %v997_v11 }
 0x221   : > { %v2633_v15 = vpop.eup %1813  ;;  %v1037_v37 = vmul.f32 1.442695, %v1014_v22 }
 0x222   : > { %v2635_v50 = vpop.eup %1815  ;;  %v1041_v61 = vmul.f32 1.442695, %v1016_v27  ;;  %v1073_v44 = vsel %vm958_vm1, %v2633_v15, 0.0  ;;  %v1047_v18 = vmul.f32 1.442695, %v1019_v39 }
 0x223   : > { %1074 = vadd.xlane.f32.xlu2 %v1073_v44  ;;  %v1061_v62 = vsel %vm958_vm1, %v2635_v50, 0.0  ;;  %v610_v44 = vadd.s32 120, %v2314_v1 }
 0x224   : > { %1817 = vpow2.f32 %v1041_v61  ;;  %1062 = vadd.xlane.f32.xlu1 %v1061_v62  ;;  %v1018_v62 = vsub.f32 %v2525_v8, %v994_v42 }
 0x226   : > { %v985_v36 = vpop.xlane.xlu0 %984 }
 0x227   : > { %v991_v58 = vpop.xlane.xlu2 %990  ;;  %v1015_v6 = vsub.f32 %v2565_v45, %v985_v36  ;;  %v1045_v45 = vmul.f32 1.442695, %v1018_v62 }
 0x228   : > { %v1017_v59 = vsub.f32 %v2567_v53, %v991_v58 }
 0x229   : > { %v1039_v31 = vmul.f32 1.442695, %v1015_v6 }
 0x22a   : > { %v2642_v0 = vpop.eup %1817  ;;  %v1043_v17 = vmul.f32 1.442695, %v1017_v59 }
 0x22b   : > { %v1082_v40 = vsel %vm958_vm1, %v2642_v0, 0.0 }
 0x22c   : > { %1819 = vpow2.f32 %v1043_v17  ;;  %1083 = vadd.xlane.f32.xlu0 %v1082_v40 }
 0x22d   : > { %1821 = vpow2.f32 %v1047_v18 }
 0x22e   : > { %1823 = vpow2.f32 %v1037_v37  ;;  %v1000_v47 = vpop.xlane.xlu0 %999 }
 0x22f   : > { %v1020_v61 = vsub.f32 %v2575_v7, %v1000_v47  ;;  %1825 = vpow2.f32 %v1039_v31  ;;  %v1006_v7 = vpop.xlane.xlu2 %1005 }
 0x230   : > { %v1022_v42 = vsub.f32 %v2577_v55, %v1006_v7 }
 0x231   : > { %v1049_v11 = vmul.f32 1.442695, %v1020_v61 }
 0x232   : > { %v2650_v25 = vpop.eup %1819  ;;  %v1053_v17 = vmul.f32 1.442695, %v1022_v42 }
 0x233   : > { %v1085_v53 = vsel %vm958_vm1, %v2650_v25, 0.0  ;;  %v2654_v16 = vpop.eup %1821  ;;  %1827 = vpow2.f32 %v1049_v11 }
 0x234   : > { %511 = vadd.xlane.f32.xlu0 %v481_v32  ;;  %1086 = vadd.xlane.f32.xlu2 %v1085_v53  ;;  %v1091_v26 = vsel %vm958_vm1, %v2654_v16, 0.0  ;;  %v2665_v27 = vpop.eup %1823  ;;  %1829 = vpow2.f32 %v1045_v45  ;;  %v638_v45 = vadd.f32 %v2591_v63, %v2505_v46 }
 0x235   : > { %v1076_v48 = vsel %vm958_vm1, %v2665_v27, 0.0  ;;  %v2673_v58 = vpop.eup %1825 }
 0x236   : > { %v1079_v59 = vsel %vm958_vm1, %v2673_v58, 0.0 }
 0x239   : > { %v2677_v8 = vpop.eup %1827 }
 0x23a   : > { %v2680_v39 = vpop.eup %1829 }
 0x23b   : > { %v1088_v18 = vsel %vm958_vm1, %v2680_v39, 0.0 }
 0x23c   : > { %1092 = vadd.xlane.f32.xlu0 %v1091_v26  ;;  %v1003_v26 = vpop.xlane.xlu0 %1002 }
 0x23d   : > { %588 = vperm.xlu1 %1790, %v2383_v41   ;;  %v1021_v63 = vsub.f32 %v2583_v2, %v1003_v26  ;;  %v637_v2 = vadd.f32 %v2573_v54, %v2497_v52 }
 0x24c   : > { %600 = vperm.xlu2 %1792, %v2383_v41  }
 0x250   : > { %606 = vperm.xlu0 %1793, %v2383_v41  }
 0x254   : > { %1794 = vset.pattern.permute.xlu2 %v610_v44  ;;  %v2692_v44 = vpop.xlane.xlu0 %509 }
 0x258   : > { %1796 = vset.pattern.permute.xlu0 %v2106_v57 }
 0x259   : > { %742 = vperm.xlu0 %1796, %v2481_v28   ;;  %v592_v28 = vadd.s32 96, %v2314_v1  ;;  %v1094_v1 = vsel %vm958_vm1, %v2677_v8, 0.0 }
 0x25b   : > { %1791 = vset.pattern.permute.xlu1 %v592_v28 }
 0x267   : > { %1077 = vadd.xlane.f32.xlu1 %v1076_v48 }
 0x26f   : > { %1080 = vadd.xlane.f32.xlu1 %v1079_v59 }
 0x275   : > { %1095 = vadd.xlane.f32.xlu2 %v1094_v1 }
 0x276   : > { %v1060_v40 = vpop.xlane.xlu1 %1059 }
 0x277   : > { %1831 = vrcp.f32 %v1060_v40  ;;  %v1057_v32 = vpop.xlane.xlu2 %1056  ;;  %1089 = vadd.xlane.f32.xlu1 %v1088_v18  ;;  %v1051_v40 = vmul.f32 1.442695, %v1021_v63 }
 0x278   : > { %1833 = vrcp.f32 %v1057_v32 }
 0x279   : > { %1835 = vpow2.f32 %v1053_v17 }
 0x27d   : > { %v1832_v53 = vpop.eup %1831 }
 0x27e   : > { %v1834_v30 = vpop.eup %1833  ;;  %v1120_v55 = vmul.f32 %v1832_v53, %v2603_v21  ;;  %v1066_v21 = vpop.xlane.xlu0 %1065 }
 0x27f   : > { %v2687_v22 = vpop.eup %1835  ;;  %v1119_v36 = vmul.f32 %v1834_v30, %v2605_v49  ;;  %1837 = vrcp.f32 %v1066_v21  ;;  %v636_v49 = vadd.f32 %v2589_v10, %v2490_v43 }
 0x280   : > { %v1206_v37 = vpack.c.bf16 %v1120_v55, %v1120_v55  ;;  %v1100_v47 = vsel %vm958_vm1, %v2687_v22, 0.0 }
 0x281   : > { %v1205_v6 = vpack.c.bf16 %v1119_v36, %v1119_v36 }
 0x282   : > { %v1238_v31 = vunpack.c.l.b16 %v1206_v37 }
 0x283   : > { %1101 = vadd.xlane.f32.xlu0 %v1100_v47  ;;  %v1237_v61 = vunpack.c.l.b16 %v1205_v6 }
 0x285   : > { %v1253_v62 = vpack.c.b16 %v1238_v31, %v1237_v61  ;;  %v1838_v11 = vpop.eup %1837 }
 0x286   : > { %v1122_v28 = vmul.f32 %v1838_v11, %v2612_v33  ;;  %v1069_v59 = vpop.xlane.xlu0 %1068 }
 0x287   : > { %1670 = vmatmul.msk.bf16.vlgmr.msra.gmra.mxu3 %vm958_vm1, %v1253_v62 }
 0x28d   : > { %612 = vperm.xlu2 %1794, %v2383_v41  }
 0x290   : > { %594 = vperm.xlu1 %1791, %v2383_v41   ;;  %v1072_v41 = vpop.xlane.xlu2 %1071 }
 0x295   : > { %1795 = vset.pattern.permute.xlu2 %v2106_v57 }
 0x296   : > { %736 = vperm.xlu2 %1795, %v2468_v9   ;;  %v1208_v9 = vpack.c.bf16 %v1122_v28, %v1122_v28 }
 0x297   : > { %v1063_v48 = vpop.xlane.xlu1 %1062  ;;  %754 = vperm.xlu0 %1796, %v636_v49  }
 0x298   : > { %1839 = vrcp.f32 %v1063_v48  ;;  %1797 = vset.pattern.permute.xlu1 %v2106_v57  ;;  %v1240_v1 = vunpack.c.l.b16 %v1208_v9  ;;  %v1075_v54 = vpop.xlane.xlu2 %1074 }
 0x299   : > { %1841 = vrcp.f32 %v1072_v41 }
 0x29a   : > { %1843 = vrcp.f32 %v1069_v59 }
 0x29b   : > { %1845 = vpow2.f32 %v1051_v40 }
 0x29c   : > { %1847 = vrcp.f32 %v1075_v54 }
 0x29e   : > { %v1840_v7 = vpop.eup %1839  ;;  %739 = vperm.xlu2 %1795, %v2472_v19  }
 0x29f   : > { %760 = vperm.xlu0 %1796, %v638_v45   ;;  %v1121_v43 = vmul.f32 %v1840_v7, %v2635_v50  ;;  %v1842_v17 = vpop.eup %1841  ;;  %v1084_v33 = vpop.xlane.xlu0 %1083 }
 0x2a0   : > { %v1844_v46 = vpop.eup %1843  ;;  %v1124_v19 = vmul.f32 %v1842_v17, %v2626_v24 }
 0x2a1   : > { %v1207_v10 = vpack.c.bf16 %v1121_v43, %v1121_v43  ;;  %v1123_v50 = vmul.f32 %v1844_v46, %v2619_v13  ;;  %v2716_v24 = vpop.eup %1845 }
 0x2a2   : > { %v1210_v18 = vpack.c.bf16 %v1124_v19, %v1124_v19  ;;  %v1848_v47 = vpop.eup %1847 }
 0x2a3   : > { %v1239_v42 = vunpack.c.l.b16 %v1207_v10  ;;  %v1209_v53 = vpack.c.bf16 %v1123_v50, %v1123_v50  ;;  %v1125_v61 = vmul.f32 %v1848_v47, %v2633_v15 }
 0x2a5   : > { %v1254_v57 = vpack.c.b16 %v1240_v1, %v1239_v42  ;;  %v1241_v36 = vunpack.c.l.b16 %v1209_v53  ;;  %v1211_v21 = vpack.c.bf16 %v1125_v61, %v1125_v61 }
 0x2a6   : > { %748 = vperm.xlu2 %1795, %v2483_v34   ;;  %v1242_v34 = vunpack.c.l.b16 %v1210_v18 }
 0x2a7   : > { %1671 = vmatmul.msk.bf16.gmra.mxu3 %vm958_vm1, %v1254_v57  ;;  %v512_v30 = vpop.xlane.xlu0 %511  ;;  %v1087_v31 = vpop.xlane.xlu2 %1086  ;;  %v1243_v49 = vunpack.c.l.b16 %v1211_v21 }
 0x2a8   : > { %v1255_v26 = vpack.c.b16 %v1242_v34, %v1241_v36 }
 0x2ae   : > { %751 = vperm.xlu2 %1795, %v2500_v29   ;;  %v1097_v29 = vsel %vm958_vm1, %v2716_v24, 0.0 }
 0x2af   : > { %v589_v32 = vpop.permute.xlu1 %588  ;;  %v1093_v13 = vpop.xlane.xlu0 %1092 }
 0x2b0   : > { %v641_v55 = vadd.f32 %v589_v32, %v2598_v35  ;;  %v482_v35 = vmul.f32 %v2327_v5, %v423_v23  ;;  %v601_v23 = vpop.permute.xlu2 %600 }
 0x2b2   : > { %769 = vperm.xlu0 %1796, %v641_v55  }
 0x2b6   : > { %757 = vperm.xlu2 %1795, %v637_v2  }
 0x2b7   : > { %1672 = vmatmul.msk.bf16.gmra.mxu3 %vm958_vm1, %v1255_v26 }
 0x2ba   : > { %1098 = vadd.xlane.f32.xlu1 %v1097_v29 }
 0x2be   : > { %763 = vperm.xlu2 %1795, %v2585_v12  }
 0x2c2   : > { %513 = vadd.xlane.f32.xlu1 %v482_v35  ;;  %v607_v37 = vpop.permute.xlu0 %606 }
 0x2c3   : > { %v644_v52 = vadd.f32 %v607_v37, %v512_v30 }
 0x2c5   : > { %778 = vperm.xlu0 %1796, %v644_v52  }
 0x2da   : > { %v1078_v6 = vpop.xlane.xlu1 %1077 }
 0x2db   : > { %1849 = vrcp.f32 %v1078_v6  ;;  %745 = vperm.xlu1 %1797, %v2485_v38   ;;  %v643_v38 = vadd.f32 %v601_v23, %v2692_v44 }
 0x2e1   : > { %v1850_v62 = vpop.eup %1849 }
 0x2e2   : > { %v1081_v12 = vpop.xlane.xlu1 %1080  ;;  %v1126_v20 = vmul.f32 %v1850_v62, %v2665_v27 }
 0x2e3   : > { %1851 = vrcp.f32 %v1081_v12  ;;  %766 = vperm.xlu1 %1797, %v2593_v14  }
 0x2e4   : > { %v1212_v5 = vpack.c.bf16 %v1126_v20, %v1126_v20  ;;  %1853 = vrcp.f32 %v1084_v33 }
 0x2e6   : > { %v1244_v48 = vunpack.c.l.b16 %v1212_v5 }
 0x2e8   : > { %v1256_v11 = vpack.c.b16 %v1244_v48, %v1243_v49  ;;  %v1096_v57 = vpop.xlane.xlu2 %1095 }
 0x2e9   : > { %v1852_v28 = vpop.eup %1851 }
 0x2ea   : > { %1673 = vmatmul.msk.bf16.gmra.mxu3 %vm958_vm1, %v1256_v11  ;;  %v1854_v15 = vpop.eup %1853  ;;  %v1127_v45 = vmul.f32 %v1852_v28, %v2673_v58  ;;  %v1090_v41 = vpop.xlane.xlu1 %1089 }
 0x2eb   : > { %775 = vperm.xlu1 %1797, %v643_v38   ;;  %v1128_v27 = vmul.f32 %v1854_v15, %v2642_v0  ;;  %1855 = vrcp.f32 %v1090_v41 }
 0x2ec   : > { %v1213_v7 = vpack.c.bf16 %v1127_v45, %v1127_v45  ;;  %1857 = vrcp.f32 %v1087_v31 }
 0x2ed   : > { %v1214_v14 = vpack.c.bf16 %v1128_v27, %v1128_v27  ;;  %1859 = vrcp.f32 %v1096_v57  ;;  %v790_v57 = vadd.s32 4294967280, %v2509_v56 }
 0x2ee   : > { %v1245_v59 = vunpack.c.l.b16 %v1213_v7  ;;  %1861 = vrcp.f32 %v1093_v13 }
 0x2ef   : > { %v1246_v43 = vunpack.c.l.b16 %v1214_v14 }
 0x2f0   : > { %v613_v62 = vpop.permute.xlu2 %612 }
 0x2f1   : > { %v1257_v9 = vpack.c.b16 %v1246_v43, %v1245_v59  ;;  %v1856_v10 = vpop.eup %1855 }
 0x2f2   : > { %v1858_v44 = vpop.eup %1857  ;;  %v1130_v42 = vmul.f32 %v1856_v10, %v2680_v39 }
 0x2f3   : > { %v1129_v1 = vmul.f32 %v1858_v44, %v2650_v25  ;;  %v1860_v50 = vpop.eup %1859 }
 0x2f4   : > { %v1216_v58 = vpack.c.bf16 %v1130_v42, %v1130_v42  ;;  %v1862_v18 = vpop.eup %1861  ;;  %v1132_v39 = vmul.f32 %v1860_v50, %v2677_v8  ;;  %v743_v8 = vpop.permute.xlu0 %742  ;;  %v794_v42 = vadd.s32 4294967272, %v2509_v56 }
 0x2f5   : > { %v1215_v0 = vpack.c.bf16 %v1129_v1, %v1129_v1  ;;  %v1131_v25 = vmul.f32 %v1862_v18, %v2654_v16 }
 0x2f6   : > { %v1248_v46 = vunpack.c.l.b16 %v1216_v58  ;;  %v1218_v32 = vpack.c.bf16 %v1132_v39, %v1132_v39 }
 0x2f7   : > { %v1247_v63 = vunpack.c.l.b16 %v1215_v0  ;;  %v1217_v55 = vpack.c.bf16 %v1131_v25, %v1131_v25 }
 0x2f8   : > { %v737_v59 = vpop.permute.xlu2 %736 }
 0x2f9   : > { %v1258_v19 = vpack.c.b16 %v1248_v46, %v1247_v63  ;;  %v1249_v26 = vunpack.c.l.b16 %v1217_v55  ;;  %v791_v46 = vperm.slane %v743_v8, %v790_v57  ;;  %v798_v63 = vadd.s32 4294967264, %v2509_v56 }
 0x2fa   : > { %1674 = vmatmul.msk.bf16.gmra.mxu3 %vm958_vm1, %v1257_v9  ;;  %v810_v8 = vadd.s32 4294967240, %v2509_v56  ;;  %v838_v57 = vadd.s32 4294967184, %v2509_v56 }
 0x2fc   : > { %v1102_v35 = vpop.xlane.xlu0 %1101 }
 0x2fd   : > { %1863 = vrcp.f32 %v1102_v35 }
 0x300   : > { %v740_v43 = vpop.permute.xlu2 %739 }
 0x301   : > { %v787_v44 = vperm.slane %v740_v43, %v2512_v4  ;;  %v802_v4 = vadd.s32 4294967256, %v2509_v56 }
 0x302   : > { %v595_v17 = vpop.permute.xlu1 %594 }
 0x303   : > { %v642_v33 = vadd.f32 %v595_v17, %v2617_v60  ;;  %v1250_v60 = vunpack.c.l.b16 %v1218_v32  ;;  %v1864_v52 = vpop.eup %1863  ;;  %v785_v17 = vperm.slane %v737_v59, %v2509_v56 }
 0x304   : > { %v1134_v6 = vmul.f32 %v1864_v52, %v2687_v22 }
 0x305   : > { %772 = vperm.xlu2 %1795, %v642_v33   ;;  %v1259_v13 = vpack.c.b16 %v1250_v60, %v1249_v26  ;;  %v789_v0 = vsel %vm788_vm0, %v787_v44, %v785_v17  ;;  %v834_v44 = vadd.s32 4294967192, %v2509_v56  ;;  %v1694_v17 = vld [vmem:[%s2301_s23 + $0x28] sm:$0xff] }
 0x306   : > { %v1220_v23 = vpack.c.bf16 %v1134_v6, %v1134_v6  ;;  %v793_v50 = vsel %vm792_vm2, %v791_v46, %v789_v0  ;;  %v842_v46 = vadd.s32 4294967176, %v2509_v56 }
 0x308   : > { %v1252_v22 = vunpack.c.l.b16 %v1220_v23  ;;  %v749_v9 = vpop.permute.xlu2 %748 }
 0x309   : > { %v799_v32 = vperm.slane %v749_v9, %v798_v63  ;;  %v1695_v9 = vld [vmem:[%s2301_s23 + $0x30] sm:$0xff] }
 0x30a   : > { %v1294_v40 = vpop.f32.mrf.mxu3  ;;  %1675 = vmatmul.msk.bf16.gmra.mxu3 %vm958_vm1, %v1258_v19  ;;  %v755_v19 = vpop.permute.xlu0 %754 }
 0x30b   : > { %v1334_v53 = vpack.c.bf16 %v1294_v40, %v1294_v40 }
 0x30d   : > { %v2740_v36 = vunpack.c.l.b16 %v1334_v53 }
 0x310   : > { %v752_v10 = vpop.permute.xlu2 %751 }
 0x311   : > { %v803_v26 = vperm.slane %v752_v10, %v802_v4  ;;  %v1693_v4 = vld [vmem:[%s2301_s23 + $0x20] sm:$0xff] }
 0x312   : > { %v1296_v30 = vpop.f32.mrf.mxu3 }
 0x313   : > { %v1335_v34 = vpack.c.bf16 %v1296_v30, %v1296_v30  ;;  %v806_v30 = vadd.s32 4294967248, %v2509_v56 }
 0x315   : > { %v2742_v2 = vunpack.c.l.b16 %v1335_v34 }
 0x317   : > { %v1382_v29 = vpack.c.b16 %v2742_v2, %v2740_v36 }
 0x318   : > { %v758_v18 = vpop.permute.xlu2 %757 }
 0x319   : > { %v811_v6 = vperm.slane %v758_v18, %v810_v8  ;;  %v1690_v8 = vld [vmem:[%s2301_s23 + $0x8] sm:$0xff] }
 0x31a   : > { %1676 = vmatmul.msk.bf16.gmra.mxu3 %vm958_vm1, %v1259_v13 }
 0x32a   : > { %v1299_v16 = vpop.f32.mrf.mxu3 }
 0x32b   : > { %v1336_v54 = vpack.c.bf16 %v1299_v16, %v1299_v16  ;;  %v807_v16 = vperm.slane %v755_v19, %v806_v30  ;;  %v1692_v30 = vld [vmem:[%s2301_s23 + $0x18] sm:$0xff] }
 0x32d   : > { %v1099_v37 = vpop.xlane.xlu1 %1098  ;;  %v2748_v12 = vunpack.c.l.b16 %v1336_v54  ;;  %v761_v54 = vpop.permute.xlu0 %760 }
 0x32e   : > { %1865 = vrcp.f32 %v1099_v37  ;;  %v814_v37 = vadd.s32 4294967232, %v2509_v56 }
 0x332   : > { %v1301_v47 = vpop.f32.mrf.mxu3 }
 0x333   : > { %v1337_v31 = vpack.c.bf16 %v1301_v47, %v1301_v47  ;;  %v764_v47 = vpop.permute.xlu2 %763 }
 0x334   : > { %v1866_v61 = vpop.eup %1865 }
 0x335   : > { %v2750_v20 = vunpack.c.l.b16 %v1337_v31  ;;  %v514_v21 = vpop.xlane.xlu1 %513  ;;  %v1133_v5 = vmul.f32 %v1866_v61, %v2716_v24  ;;  %v818_v31 = vadd.s32 4294967224, %v2509_v56 }
 0x336   : > { %v645_v49 = vadd.f32 %v613_v62, %v514_v21  ;;  %v815_v62 = vperm.slane %v761_v54, %v814_v37  ;;  %v822_v21 = vadd.s32 4294967216, %v2509_v56 }
 0x337   : > { %v1219_v48 = vpack.c.bf16 %v1133_v5, %v1133_v5  ;;  %v1383_v11 = vpack.c.b16 %v2750_v20, %v2748_v12 }
 0x338   : > { %781 = vperm.xlu2 %1795, %v645_v49   ;;  %v819_v49 = vperm.slane %v764_v47, %v818_v31 }
 0x339   : > { %v1251_v28 = vunpack.c.l.b16 %v1219_v48 }
 0x33a   : > { %v1304_v38 = vpop.f32.mrf.mxu3 }
 0x33b   : > { %v1260_v15 = vpack.c.b16 %v1252_v22, %v1251_v28  ;;  %v1338_v45 = vpack.c.bf16 %v1304_v38, %v1304_v38  ;;  %v830_v28 = vadd.s32 4294967200, %v2509_v56  ;;  %v826_v38 = vadd.s32 4294967208, %v2509_v56 }
 0x33d   : > { %1677 = vmatmul.msk.bf16.gmra.mxu3 %vm958_vm1, %v1260_v15  ;;  %v2756_v7 = vunpack.c.l.b16 %v1338_v45  ;;  %v770_v15 = vpop.permute.xlu0 %769 }
 0x33e   : > { %v827_v10 = vperm.slane %v770_v15, %v826_v38 }
 0x342   : > { %v1306_v27 = vpop.f32.mrf.mxu3 }
 0x343   : > { %v1339_v41 = vpack.c.bf16 %v1306_v27, %v1306_v27 }
 0x345   : > { %v2758_v14 = vunpack.c.l.b16 %v1339_v41  ;;  %v1696_v41 = vld [vmem:[%s2301_s23 + $0x38] sm:$0xff]  ;;  %v779_v0 = vpop.permute.xlu0 %778 }
 0x346   : > { %1191 = vmatpush.bf16.msra.mxu2 %v1696_v41 }
 0x347   : > { %v1384_v24 = vpack.c.b16 %v2758_v14, %v2756_v7 }
 0x34a   : > { %1192 = vmatpush.bf16.msra.mxu2 %v1695_v9 }
 0x34d   : > { %v746_v58 = vpop.permute.xlu1 %745 }
 0x34e   : > { %v795_v33 = vperm.slane %v746_v58, %v794_v42  ;;  %1193 = vmatpush.bf16.msra.mxu2 %v1694_v17 }
 0x350   : > { %v797_v39 = vsel %vm796_vm3, %v795_v33, %v793_v50  ;;  %v839_v50 = vperm.slane %v779_v0, %v838_v57 }
 0x351   : > { %v801_v55 = vsel %vm800_vm4, %v799_v32, %v797_v39 }
 0x352   : > { %v805_v35 = vsel %vm804_vm5, %v803_v26, %v801_v55  ;;  %1194 = vmatpush.bf16.msra.mxu2 %v1693_v4  ;;  %v1691_v26 = vld [vmem:[%s2301_s23 + $0x10] sm:$0xff] }
 0x353   : > { %v809_v52 = vsel %vm808_vm6, %v807_v16, %v805_v35  ;;  %v1689_v35 = vld [vmem:[%s2301_s23] sm:$0xff] }
 0x354   : > { %v813_v61 = vsel %vm812_vm7, %v811_v6, %v809_v52 }
 0x355   : > { %v767_v5 = vpop.permute.xlu1 %766  ;;  %v817_v23 = vsel %vm816_vm8, %v815_v62, %v813_v61 }
 0x356   : > { %v823_v48 = vperm.slane %v767_v5, %v822_v21  ;;  %v821_v45 = vsel %vm820_vm9, %v819_v49, %v817_v23  ;;  %1195 = vmatpush.bf16.msra.mxu2 %v1692_v30 }
 0x358   : > { %v825_v59 = vsel %vm824_vm10, %v823_v48, %v821_v45 }
 0x35a   : > { %1196 = vmatpush.bf16.msra.mxu2 %v1691_v26 }
 0x35d   : > { %v776_v42 = vpop.permute.xlu1 %775 }
 0x35e   : > { %v835_v33 = vperm.slane %v776_v42, %v834_v44  ;;  %1197 = vmatpush.bf16.msra.mxu2 %v1690_v8 }
 0x35f   : > { %v773_v27 = vpop.permute.xlu2 %772 }
 0x360   : > { %v831_v43 = vperm.slane %v773_v27, %v830_v28 }
 0x362   : > { %1198 = vmatpush.bf16.msra.mxu2 %v1689_v35 }
 0x36d   : > { %v1309_v1 = vpop.f32.mrf.mxu3 }
 0x36e   : > { %v1340_v40 = vpack.c.bf16 %v1309_v1, %v1309_v1  ;;  %v829_v1 = vsel %vm828_vm11, %v827_v10, %v825_v59 }
 0x36f   : > { %v833_v58 = vsel %vm832_vm12, %v831_v43, %v829_v1 }
 0x370   : > { %v2770_v34 = vunpack.c.l.b16 %v1340_v40  ;;  %v837_v19 = vsel %vm836_vm13, %v835_v33, %v833_v58 }
 0x371   : > { %v841_v39 = vsel %vm840_vm14, %v839_v50, %v837_v19 }
 0x375   : > { %v1311_v25 = vpop.f32.mrf.mxu3 }
 0x376   : > { %v1341_v53 = vpack.c.bf16 %v1311_v25, %v1311_v25 }
 0x378   : > { %v2772_v60 = vunpack.c.l.b16 %v1341_v53 }
 0x37a   : > { %v1385_v13 = vpack.c.b16 %v2772_v60, %v2770_v34 }
 0x37d   : > { %v2781_v22 = vpop.f32.mrf.mxu3 }
 0x37e   : > { %v1342_v15 = vpack.c.bf16 %v2781_v22, %v2781_v22 }
 0x380   : > { %v1374_v59 = vunpack.c.l.b16 %v1342_v15 }
 0x385   : > { %v1316_v63 = vpop.f32.mrf.mxu3 }
 0x386   : > { %v1343_v48 = vpack.c.bf16 %v1316_v63, %v1316_v63 }
 0x388   : > { %v1375_v27 = vunpack.c.l.b16 %v1343_v48 }
 0x38a   : > { %v1386_v43 = vpack.c.b16 %v1375_v27, %v1374_v59 }
 0x38d   : > { %v1319_v56 = vpop.f32.mrf.mxu3 }
 0x38e   : > { %v1344_v23 = vpack.c.bf16 %v1319_v56, %v1319_v56 }
 0x390   : > { %v1376_v45 = vunpack.c.l.b16 %v1344_v23 }
 0x392   : > { %v782_v40 = vpop.permute.xlu2 %781 }
 0x393   : > { %v843_v18 = vperm.slane %v782_v40, %v842_v46 }
 0x395   : > { %v845_v25 = vsel %vm844_vm15, %v843_v18, %v841_v39  ;;  %v1321_v55 = vpop.f32.mrf.mxu3 }
 0x396   : > { %v871_v32 = vadd.f32 %v2503_v3, %v845_v25  ;;  %v869_v53 = vadd.f32 %v2495_v51, %v845_v25  ;;  %v1345_v62 = vpack.c.bf16 %v1321_v55, %v1321_v55 }
 0x398   : > { %875 = vmax.xlane.f32.xlu0 %v871_v32  ;;  %873 = vmax.xlane.f32.xlu1 %v869_v53  ;;  %v1377_v28 = vunpack.c.l.b16 %v1345_v62 }
 0x39a   : > { %v1387_v41 = vpack.c.b16 %v1377_v28, %v1376_v45 }
 0x39d   : > { %v1324_v16 = vpop.f32.mrf.mxu3 }
 0x39e   : > { %v1346_v47 = vpack.c.bf16 %v1324_v16, %v1324_v16 }
 0x3a0   : > { %v1378_v49 = vunpack.c.l.b16 %v1346_v47 }
 0x3a5   : > { %v1326_v37 = vpop.f32.mrf.mxu3 }
 0x3a6   : > { %v1347_v6 = vpack.c.bf16 %v1326_v37, %v1326_v37 }
 0x3a8   : > { %v1379_v21 = vunpack.c.l.b16 %v1347_v6 }
 0x3aa   : > { %v1388_v38 = vpack.c.b16 %v1379_v21, %v1378_v49 }
 0x3c0   : > { %v1329_v52 = vpop.f32.mrf.mxu3 }
 0x3c1   : > { %v1348_v54 = vpack.c.bf16 %v1329_v52, %v1329_v52 }
 0x3c3   : > { %v1380_v31 = vunpack.c.l.b16 %v1348_v54 }
 0x3c8   : > { %v1331_v3 = vpop.f32.mrf.mxu3 }
 0x3c9   : > { %v1349_v51 = vpack.c.bf16 %v1331_v3, %v1331_v3 }
 0x3cb   : > { %v1381_v61 = vunpack.c.l.b16 %v1349_v51 }
 0x3cd   : > { %v1389_v5 = vpack.c.b16 %v1381_v61, %v1380_v31 }
 0x3cf   : > { %1398 = vmatpush.bf16.msrb.mxu2 %v1389_v5 }
 0x3d3   : > { %1399 = vmatpush.bf16.msrb.mxu2 %v1388_v38 }
 0x3d7   : > { %1400 = vmatpush.bf16.msrb.mxu2 %v1387_v41 }
 0x3db   : > { %1401 = vmatpush.bf16.msrb.mxu2 %v1386_v43 }
 0x3df   : > { %1402 = vmatpush.bf16.msrb.mxu2 %v1385_v13 }
 0x3e3   : > { %1403 = vmatpush.bf16.msrb.mxu2 %v1384_v24 }
 0x3e7   : > { %1404 = vmatpush.bf16.msrb.mxu2 %v1383_v11 }
 0x3eb   : > { %1405 = vmatpush.bf16.msrb.mxu2 %v1382_v29 }
 0x40b   : > { %v876_v22 = vpop.xlane.xlu0 %875  ;;  %v874_v9 = vpop.xlane.xlu1 %873 }
 0x40c   : > { %v878_v10 = vsub.f32 %v871_v32, %v876_v22  ;;  %v877_v44 = vsub.f32 %v869_v53, %v874_v9 }
 0x40e   : > { %v881_v42 = vmul.f32 1.442695, %v878_v10  ;;  %v879_v1 = vmul.f32 1.442695, %v877_v44 }
 0x410   : > { %1867 = vpow2.f32 %v881_v42 }
 0x411   : > { %1869 = vpow2.f32 %v879_v1 }
 0x416   : > { %v1868_v34 = vpop.eup %1867 }
 0x417   : > { %v1870_v60 = vpop.eup %1869  ;;  %885 = vadd.xlane.f32.xlu1 %v1868_v34 }
 0x418   : > { %883 = vadd.xlane.f32.xlu2 %v1870_v60 }
 0x48a   : > { %v886_v7 = vpop.xlane.xlu1 %885 }
 0x48b   : > { %v884_v12 = vpop.xlane.xlu2 %883  ;;  %1871 = vrcp.f32 %v886_v7 }
 0x48c   : > { %1873 = vrcp.f32 %v884_v12 }
 0x491   : > { %v1872_v36 = vpop.eup %1871 }
 0x492   : > { %v1874_v2 = vpop.eup %1873  ;;  %v890_v29 = vmul.f32 %v1872_v36, %v1868_v34 }
 0x493   : > { %v889_v20 = vmul.f32 %v1874_v2, %v1870_v60 }
 0x494   : > { %v1136_v11 = vpack.c.bf16 %v890_v29, %v890_v29 }
 0x495   : > { %v1135_v14 = vpack.c.bf16 %v889_v20, %v889_v20 }
 0x496   : > { %v1140_v24 = vunpack.c.l.b16 %v1136_v11 }
 0x497   : > { %v1139_v13 = vunpack.c.l.b16 %v1135_v14 }
 0x499   : > { %v1141_v57 = vpack.c.b16 %v1140_v24, %v1139_v13 }
 0x49b   : > { %1199 = vmatmul.bf16.vlgmr.msra.gmra.mxu2 %v1141_v57 }
 0x4ab   : > { %1406 = vmatmul.bf16.vlgmr.msrb.gmra.mxu2 %v1141_v57 }
 0x51e   : > { %v1200_v58 = vpop.f32.mrf.mxu2 }
 0x51f   : > { %1412 = vst [vmem:[%s375_s1] sm:$0xff] %v1200_v58 }
 0x526   : > { %v1202_v17 = vpop.f32.mrf.mxu2 }
 0x527   : > { %1413 = vst [vmem:[%s375_s1 + $0x8] sm:$0xff] %v1202_v17 }
 0x528   : > { %2022 = shalt.err (!%p2019_p7)
}
 0x529   : > { %s2107_s20 = smov 128   ;;  %s2108_s28 = smov 8  }
 0x52a   : > { %1710 = dma.vmem_to_hbm [thread:$0]  (%p2231_p11), %s1435_s18, 256, %s1437_s26, %s1417_s30, %s2107_s20, %s2107_s20, %s2108_s28  }
 0x52b   : > { %s382_s12 = scalar_lea.vmem [#allocation11], %s1632_s8  ;;  %s1450_s9 = scalar_lea.hbm %s2879_s6, %s1697_s27 }
 0x52c   : > { %s1451_s7 = sshll.u32 %s382_s12, 4  ;;  %s1453_s16 = sshll.u32 %s1450_s9, 4  ;;  %s1452_s7 = int_to_ptr.vmem [resolvable:$true] %s1451_s7  ;;  %s1454_s16 = int_to_ptr.hbm [resolvable:$true] %s1453_s16 }
 0x52d   : > { %s1422_s19 = scalar_lea.sflag [#allocation12], %s2291_s29  ;;  %s2037_s23 = sshra.s32 %s1454_s16, 4  ;;  %s2038_s23 = int_to_ptr.hbm [resolvable:$true] %s2037_s23 }
 0x52e   : > { %v1407_v0 = vpop.f32.mrf.mxu2  ;;  %s2039_s18 = scalar_lea.hbm %s2038_s23, 16  ;;  %s2043_s26 = scalar_lea.hbm %s2879_s6, 32 }
 0x52f   : > { %1414 = vst [vmem:[%s382_s12] sm:$0xff] %v1407_v0  ;;  %p2040_p10 = scmp.ne.s32.totalorder %s2038_s23, %s2039_s18  ;;  %p2044_p2 = scmp.lt.s32.totalorder %s2038_s23, %s2879_s6 }
 0x530   : > { %p2045_p6 = scmp.lt.s32.totalorder %s2043_s26, %s2039_s18 }
 0x531   : > { %p2041_p13 = pnand %p2040_p10, %p2231_p11 }
 0x532   : > { %p2046_p8 = por %p2045_p6, %p2044_p2 }
 0x533   : > { %p2042_p0 = pneg %p2041_p13 }
 0x535   : > { %p2047_p4 = pnand %p2046_p8, %p2042_p0 }
 0x536   : > { %v1409_v33 = vpop.f32.mrf.mxu2 }
 0x537   : > { %1415 = vst [vmem:[%s382_s12 + $0x8] sm:$0xff] %v1409_v33 }
 0x538   : > { %2050 = shalt.err (!%p2047_p4)
}
 0x539   : > { %1711 = dma.vmem_to_hbm [thread:$0]  (%p2231_p11), %s1452_s7, 256, %s1454_s16, %s1422_s19, %s2107_s20, %s2107_s20, %s2108_s28  }
 0x53a PF: > { %s1468_s29 = sand.u32 1, %s2089_s21   ;;  %p2899_p9 = scmp.ge.s32.totalorder %s2101_s24, 2 }
 0x53b   : > { %s1469_s25 = scalar_lea.sflag [#allocation4], %s1468_s29 }
 0x53c   : > { %p1729_p1 = pnand %p2899_p9, %p2235_p12 }
 0x53e   : > { %p1730_p3 = pneg %p1729_p1 }
 0x540   : > { %2080 = dma.done.wait (%p1730_p3), %s1469_s25, 256  }
 0x541   : > { %2082 = vsyncadd (%p1730_p3), %s1469_s25, 4294967040  ;;  %s1479_s13 = scalar_lea.sflag [#allocation12], %s1468_s29 }
 0x542   : > { %2084 = dma.done.wait (%p1730_p3), %s1479_s13, 256  }
 0x543   : > { %2086 = vsyncadd (%p1730_p3), %s1479_s13, 4294967040  ;;  %s2900_s24 = sld [smem:[#allocation19_spill]]  ;;  %s2903_s21 = smov %s2093_s22 }
 0x544   : > { %s2901_s11 = sld [smem:[#allocation18_spill]] }
 0x545   : > { %s2902_s23 = sld [smem:[#allocation20_spill]] }
 0x549   : > { %p27_p11 = scmp.ge.s32.totalorder %s2900_s24, 4  }
 0x54a   : > { %s2904_s22 = smov %s2901_s11 }
 0x54b   :  { %29 = sbr.rel (!%p27_p11) target bundleno = 13 (0xd), region = 133 }
 0x550   :  { %1485 = vsyncpa [#allocation3], 1 }
 0x551   :  { %1487 = vsyncpa [#allocation3 + $0x1], 1 }
 0x552   :  { %1488 = vsyncpa [#allocation6], 1 }
 0x553   :  { %1490 = vsyncpa [#allocation6 + $0x1], 1 }
 0x554   :  { %1491 = vsyncpa [#allocation9], 1 }
 0x555   :  { %1492 = vsyncpa [#allocation4], 1 }
 0x556   :  { %1494 = vsyncpa [#allocation4 + $0x1], 1 }
 0x557   :  { %1495 = vsyncpa [#allocation12], 1 }
 0x558   :  { %1497 = vsyncpa [#allocation12 + $0x1], 1 }

</bundles_post_ra>
